<compile_context>
chip_gen: v5e
topology: v5e:2x2
jax: 0.10.0
libtpu: 0.0.40
codegen_flags: <defaults>
</compile_context>

<pallas_src>
import math
from functools import partial

import jax
import jax.numpy as jnp
from jax.experimental import pallas as pl
from jax.experimental.pallas import tpu as pltpu

# --- KANLinear hyperparameters (defaults of the PyTorch module) -------------
GRID_SIZE = 5
SPLINE_ORDER = 3
GRID_RANGE = (-1.0, 1.0)
H = (GRID_RANGE[1] - GRID_RANGE[0]) / GRID_SIZE
GRID_PTS = [
    GRID_RANGE[0] + H * (t - SPLINE_ORDER)
    for t in range(GRID_SIZE + 2 * SPLINE_ORDER + 1)
]
NUM_BASES = GRID_SIZE + SPLINE_ORDER  # = 8

DELTA = 0.5  # bounded-confidence interval


def _b_spline_bases(x):
    """Cox-de Boor recursion, matching KANLinear.b_splines.

    x: (M, F) float32.  Returns a list of NUM_BASES (M, F) arrays.
    Knot spacings are Python constants (folded into reciprocal multiplies),
    and (x - g[t]) terms are recomputed inline so consumed bases / temporaries
    die immediately (lower vreg pressure than caching an xm[] list).
    """
    g = GRID_PTS
    bases = [
        jnp.where((x >= g[t]) & (x < g[t + 1]), 1.0, 0.0).astype(jnp.float32)
        for t in range(len(g) - 1)
    ]
    for k in range(1, SPLINE_ORDER + 1):
        new_bases = []
        for t in range(len(bases) - 1):
            inv_l = 1.0 / (g[t + k] - g[t])          # Python constants -> multiplies
            inv_r = 1.0 / (g[t + k + 1] - g[t + 1])
            left = (x - g[t]) * inv_l
            right = (g[t + k + 1] - x) * inv_r
            new_bases.append(left * bases[t] + right * bases[t + 1])
        bases = new_bases
    assert len(bases) == NUM_BASES
    return bases


def _simp_kernel(x_ref, adj_ref, w_ref, b_ref, kanw_ref, o_ref, *, delta):
    BB, N, F_in = x_ref.shape
    F_pad = w_ref.shape[1]

    x = x_ref[...]                                    # (BB, N, F_in) f32
    adj = adj_ref[...].astype(jnp.float32)            # bf16 0/1 mask -> f32 (exact)

    # --- bounded-confidence mask via Gram identity (kept f32 for mask stability)
    gram = jnp.einsum("bnf,bmf->bnm", x, x, preferred_element_type=jnp.float32)
    x2 = x * x
    sq_i = jnp.sum(x2, axis=-1, keepdims=True)        # (BB, N, 1)
    sq_j = jnp.sum(x2, axis=-1)[:, None, :]            # (BB, 1, N)
    dist2 = jnp.maximum(sq_i + sq_j - 2.0 * gram, 0.0)
    mask = (dist2 <= delta * delta).astype(jnp.float32)

    adj_w = adj * mask
    degree = jnp.sum(adj_w, axis=-1, keepdims=True) + 1e-6
    adj_w = adj_w * pl.reciprocal(degree, approx=True)   # EUP slot, off the VALU path

    # --- message aggregation + (padded, lane-dense) linear projection ----------
    agg = jnp.einsum("bnm,bmf->bnf", adj_w, x, preferred_element_type=jnp.float32)
    h = agg.reshape(BB * N, F_in)
    out = jnp.dot(h, w_ref[...], preferred_element_type=jnp.float32) + b_ref[...]
    out = jnp.maximum(out, 0.0)                        # ReLU; padded cols stay 0

    # --- KANLinear updater: single fused bf16 matmul ---------------------------
    # features = [ SiLU(out) | B-spline bases(out) ]  (each piece F_pad wide,
    # 128-lane aligned), weights = [ base_weight^T ; scaled_spline^T ].
    silu = out * jax.nn.sigmoid(out)
    pieces = [silu] + _b_spline_bases(out)             # 1 + NUM_BASES pieces
    feats = jnp.concatenate([p.astype(jnp.bfloat16) for p in pieces], axis=-1)
    res = jnp.dot(feats, kanw_ref[...], preferred_element_type=jnp.float32)

    o_ref[...] = res.reshape(BB, N, F_pad)


def _step_vmem_bytes(BB, N, F_in, F_pad):
    """Rough per-grid-step VMEM footprint (tiles double-buffered + intermediates)."""
    M = BB * N
    io = 2 * (BB * N * F_in * 4 + BB * N * N * 2 + BB * N * F_pad * 4)
    wts = 2 * (F_in * F_pad * 4 + F_pad * 4 + (1 + NUM_BASES) * F_pad * F_pad * 2)
    inter = (3 * BB * N * N * 4                       # gram / dist2 / weighted adj
             + 4 * M * F_pad * 4                      # out, silu, temporaries
             + 12 * M * F_pad * 4                     # live Cox-de Boor level
             + M * (1 + NUM_BASES) * F_pad * 2)       # bf16 feature slab
    return io + wts + inter


def _pick_batch_block(B, N, F_in, F_pad, *, target_rows, min_steps, vmem_budget):
    """Largest divisor of B s.t. BB*N <= target_rows, grid >= min_steps,
    and the per-step VMEM estimate stays under budget."""
    best = 1
    for cand in range(1, B + 1):
        if B % cand:
            continue
        if cand > 1 and B // cand < min_steps:
            continue
        if cand > 1 and cand * N > max(target_rows, N):
            continue
        if cand > 1 and _step_vmem_bytes(cand, N, F_in, F_pad) > vmem_budget:
            continue
        best = cand
    return best


def sociological_message_passing(x, adj, weight, bias, base_weight, spline_weight,
                                 spline_scaler, *, delta=DELTA, target_rows=512):
    """Pallas-backed forward pass matching SociallogicalInformedMessagePassing."""
    B, N, F_in = x.shape
    F_out = weight.shape[1]
    F_pad = ((F_out + 127) // 128) * 128              # lane-dense output width

    # --- device-aware tiling knobs ---------------------------------------------
    try:
        kind = jax.devices()[0].device_kind.lower()
    except Exception:  # pragma: no cover
        kind = ""
    is_v7 = "v7" in kind
    min_steps = 2 if is_v7 else 1                     # feed both TCs on v7x
    vmem_budget = (48 << 20) if is_v7 else (100 << 20)  # 64 MiB vs 128 MiB physical

    BB = _pick_batch_block(B, N, F_in, F_pad, target_rows=target_rows,
                           min_steps=min_steps, vmem_budget=vmem_budget)

    # --- parameter preprocessing (plain JAX), zero-padded to F_pad -------------
    weight_p = jnp.zeros((F_in, F_pad), jnp.float32).at[:, :F_out].set(weight)
    bias_p = jnp.zeros((1, F_pad), jnp.float32).at[0, :F_out].set(bias)

    bwT = jnp.zeros((F_pad, F_pad), jnp.float32).at[:F_out, :F_out].set(base_weight.T)
    scaled_spline = spline_weight * spline_scaler[..., None]     # (out, in, NUM_BASES)
    sw = jnp.zeros((F_pad, F_pad, NUM_BASES), jnp.float32)
    sw = sw.at[:F_out, :F_out, :].set(scaled_spline)
    swT = jnp.transpose(sw, (2, 1, 0)).reshape(NUM_BASES * F_pad, F_pad)
    # fused KAN weight: [base ; spline], bf16 MXU operand (f32 accumulation)
    kan_w = jnp.concatenate([bwT, swT], axis=0).astype(jnp.bfloat16)

    adj_b = adj.astype(jnp.bfloat16)   # 0/1 mask is exact in bf16; halves HBM stream

    M = B * N
    flops = (4 * B * N * N * F_in
             + 2 * M * F_in * F_pad
             + 2 * M * (1 + NUM_BASES) * F_pad * F_pad)
    cost = pl.CostEstimate(
        flops=int(flops),
        transcendentals=int(M * F_pad + B * N),
        bytes_accessed=int(4 * x.size + 2 * adj.size
                           + 4 * (F_in * F_pad + F_pad)
                           + 2 * (1 + NUM_BASES) * F_pad * F_pad
                           + 4 * B * N * F_pad))

    vmem_limit = int(min(vmem_budget,
                         max(2 * _step_vmem_bytes(BB, N, F_in, F_pad), 32 << 20)))

    kernel = partial(_simp_kernel, delta=delta)
    out_full = pl.pallas_call(
        kernel,
        out_shape=jax.ShapeDtypeStruct((B, N, F_pad), jnp.float32),
        grid=(B // BB,),
        in_specs=[
            pl.BlockSpec((BB, N, F_in), lambda b: (b, 0, 0)),
            pl.BlockSpec((BB, N, N), lambda b: (b, 0, 0)),
            pl.BlockSpec((F_in, F_pad), lambda b: (0, 0)),
            pl.BlockSpec((1, F_pad), lambda b: (0, 0)),
            pl.BlockSpec(((1 + NUM_BASES) * F_pad, F_pad), lambda b: (0, 0)),
        ],
        out_specs=pl.BlockSpec((BB, N, F_pad), lambda b: (b, 0, 0)),
        compiler_params=pltpu.CompilerParams(
            dimension_semantics=("parallel",),
            vmem_limit_bytes=vmem_limit),
        cost_estimate=cost,
    )(x, adj_b, weight_p, bias_p, kan_w)

    return out_full[..., :F_out]   # drop the zero-padded lanes


def reference_forward(x, adj, weight, bias, base_weight, spline_weight,
                      spline_scaler, *, delta=DELTA):
    """Pure-JAX reference mirroring the PyTorch forward (sqrt distance, exact div, f32)."""
    diff = x[:, :, None, :] - x[:, None, :, :]
    dist = jnp.sqrt(jnp.sum(diff * diff, axis=-1))
    mask = (dist <= delta).astype(jnp.float32)
    adj_w = adj * mask
    degree = jnp.sum(adj_w, axis=-1, keepdims=True) + 1e-6
    adj_w = adj_w / degree
    agg = jnp.einsum("bij,bjf->bif", adj_w, x)
    out = jnp.einsum("bnf,fo->bno", agg, weight) + bias
    out = jax.nn.relu(out)

    F_out = weight.shape[1]
    flat = out.reshape(-1, F_out)
    base = (flat * jax.nn.sigmoid(flat)) @ base_weight.T
    scaled_spline = spline_weight * spline_scaler[..., None]
    bases = _b_spline_bases(flat)
    spline = sum(bases[t] @ scaled_spline[:, :, t].T for t in range(NUM_BASES))
    return (base + spline).reshape(out.shape)


if __name__ == "__main__":
    # small, module-consistent shapes
    B, N, F_in, F_out = 2, 16, 8, 32

    key = jax.random.PRNGKey(0)
    kx, kadj, kw, kbw, ksw, ksc = jax.random.split(key, 6)

    # inputs
    x = 0.3 * jax.random.normal(kx, (B, N, F_in), jnp.float32)
    adj = (jax.random.uniform(kadj, (B, N, N)) < 0.5).astype(jnp.float32)

    # deterministic parameter init (shapes match the PyTorch module __init__)
    xavier_bound = math.sqrt(6.0 / (F_in + F_out))
    weight = jax.random.uniform(kw, (F_in, F_out), jnp.float32,
                                -xavier_bound, xavier_bound)
    bias = jnp.zeros((F_out,), jnp.float32)

    # KANLinear(F_out, F_out) parameters (synthetic deterministic init,
    # same shapes as the module; no checkpoint loading).
    kan_bound = math.sqrt(6.0 / F_out) / math.sqrt(6.0)
    base_weight = jax.random.uniform(kbw, (F_out, F_out), jnp.float32,
                                     -kan_bound, kan_bound)
    spline_weight = 0.05 * jax.random.normal(ksw, (F_out, F_out, NUM_BASES), jnp.float32)
    spline_scaler = 1.0 + 0.1 * jax.random.normal(ksc, (F_out, F_out), jnp.float32)

    out = sociological_message_passing(
        x, adj, weight, bias, base_weight, spline_weight, spline_scaler)
    out = jax.block_until_ready(out)

    ref = reference_forward(
        x, adj, weight, bias, base_weight, spline_weight, spline_scaler)
    ref = jax.block_until_ready(ref)

    assert out.shape == (B, N, F_out)
    # tolerance 2e-2: the KAN features/weights go through the MXU in bf16
    # (f32 accumulation), and the degree normalization uses the EUP approx
    # reciprocal; both are small relative (<~1%) deviations from the f32 ref.
    assert jnp.allclose(out, ref, atol=2e-2, rtol=2e-2), \
        f"max abs diff {jnp.max(jnp.abs(out - ref))}"

    print("KERNEL_OK")
</pallas_src>

<mosaic_0001>
module attributes {stable_mosaic.version = 11 : i64} {
  func.func @_simp_kernel(%arg0: i32, %arg1: memref<2x16x8xf32, #tpu.memory_space<vmem>>, %arg2: memref<2x16x16xbf16, #tpu.memory_space<vmem>>, %arg3: memref<8x128xf32, #tpu.memory_space<vmem>>, %arg4: memref<1x128xf32, #tpu.memory_space<vmem>>, %arg5: memref<1152x128xbf16, #tpu.memory_space<vmem>>, %arg6: memref<2x16x128xf32, #tpu.memory_space<vmem>>) attributes {dimension_semantics = [#tpu.dimension_semantics<parallel>], iteration_bounds = array<i64: 1>, scalar_prefetch = 0 : i64, scratch_operands = 0 : i64, tpu.core_type = #tpu.core_type<tc>, window_params = [{transform_indices = @transform_0, window_bounds = array<i64: 2, 16, 8>}, {transform_indices = @transform_1, window_bounds = array<i64: 2, 16, 16>}, {pipeline_mode = #tpu.pipeline_mode<synchronous>, transform_indices = @transform_2, window_bounds = array<i64: 8, 128>}, {pipeline_mode = #tpu.pipeline_mode<synchronous>, transform_indices = @transform_3, window_bounds = array<i64: 1, 128>}, {pipeline_mode = #tpu.pipeline_mode<synchronous>, transform_indices = @transform_4, window_bounds = array<i64: 1152, 128>}, {transform_indices = @transform_5, window_bounds = array<i64: 2, 16, 128>}]} {
    %c0 = arith.constant 0 : index
    %c0_0 = arith.constant 0 : index
    %c0_1 = arith.constant 0 : index
    %0 = vector.load %arg1[%c0, %c0_0, %c0_1] : memref<2x16x8xf32, #tpu.memory_space<vmem>>, vector<2x16x8xf32>
    %c0_2 = arith.constant 0 : index
    %c0_3 = arith.constant 0 : index
    %c0_4 = arith.constant 0 : index
    %1 = vector.load %arg2[%c0_2, %c0_3, %c0_4] : memref<2x16x16xbf16, #tpu.memory_space<vmem>>, vector<2x16x16xbf16>
    %2 = arith.extf %1 : vector<2x16x16xbf16> to vector<2x16x16xf32>
    "tpu.trace_start"() <{level = 10 : i32, message = "bnf,bmf->bnm"}> : () -> ()
    %cst = arith.constant dense<0.000000e+00> : vector<2x16x16xf32>
    %3 = tpu.matmul %0, %0, %cst {dimension_numbers = #tpu.dot_dimension_numbers<[2], [2], [1], [1], [0, 0, 0, 1, 1, 1], [0], [0]>} : vector<2x16x8xf32>, vector<2x16x8xf32>, vector<2x16x16xf32> -> vector<2x16x16xf32>
    "tpu.trace_stop"() : () -> ()
    %4 = arith.mulf %0, %0 : vector<2x16x8xf32>
    %cst_5 = arith.constant dense<0.000000e+00> : vector<2x16xf32>
    %5 = vector.multi_reduction <add>, %4, %cst_5 [2] : vector<2x16x8xf32> to vector<2x16xf32>
    %6 = vector.shape_cast %5 : vector<2x16xf32> to vector<2x16x1xf32>
    %cst_6 = arith.constant dense<0.000000e+00> : vector<2x16xf32>
    %7 = vector.multi_reduction <add>, %4, %cst_6 [2] : vector<2x16x8xf32> to vector<2x16xf32>
    %8 = vector.shape_cast %7 : vector<2x16xf32> to vector<2x1x16xf32>
    %9 = vector.broadcast %6 : vector<2x16x1xf32> to vector<2x16x16xf32>
    %10 = vector.broadcast %8 : vector<2x1x16xf32> to vector<2x16x16xf32>
    %11 = arith.addf %9, %10 : vector<2x16x16xf32>
    %cst_7 = arith.constant 2.000000e+00 : f32
    %12 = vector.broadcast %cst_7 : f32 to vector<2x16x16xf32>
    %13 = arith.mulf %12, %3 : vector<2x16x16xf32>
    %14 = arith.subf %11, %13 : vector<2x16x16xf32>
    %cst_8 = arith.constant 0.000000e+00 : f32
    %15 = vector.broadcast %cst_8 : f32 to vector<2x16x16xf32>
    %16 = arith.maximumf %14, %15 : vector<2x16x16xf32>
    %cst_9 = arith.constant 2.500000e-01 : f32
    %17 = vector.broadcast %cst_9 : f32 to vector<2x16x16xf32>
    %18 = arith.cmpf ole, %16, %17 : vector<2x16x16xf32>
    %19 = arith.extui %18 : vector<2x16x16xi1> to vector<2x16x16xi32>
    %20 = arith.sitofp %19 : vector<2x16x16xi32> to vector<2x16x16xf32>
    %21 = arith.mulf %2, %20 : vector<2x16x16xf32>
    %cst_10 = arith.constant dense<0.000000e+00> : vector<2x16xf32>
    %22 = vector.multi_reduction <add>, %21, %cst_10 [2] : vector<2x16x16xf32> to vector<2x16xf32>
    %23 = vector.shape_cast %22 : vector<2x16xf32> to vector<2x16x1xf32>
    %cst_11 = arith.constant 9.99999997E-7 : f32
    %24 = vector.broadcast %cst_11 : f32 to vector<2x16x1xf32>
    %25 = arith.addf %23, %24 : vector<2x16x1xf32>
    %26 = tpu.reciprocal %25 {approx = true} : vector<2x16x1xf32> -> vector<2x16x1xf32>
    %27 = vector.broadcast %26 : vector<2x16x1xf32> to vector<2x16x16xf32>
    %28 = arith.mulf %21, %27 : vector<2x16x16xf32>
    "tpu.trace_start"() <{level = 10 : i32, message = "bnm,bmf->bnf"}> : () -> ()
    %cst_12 = arith.constant dense<0.000000e+00> : vector<2x16x8xf32>
    %29 = tpu.matmul %28, %0, %cst_12 {dimension_numbers = #tpu.dot_dimension_numbers<[2], [1], [1], [2], [0, 0, 0, 1, 1, 2], [0], [0]>} : vector<2x16x16xf32>, vector<2x16x8xf32>, vector<2x16x8xf32> -> vector<2x16x8xf32>
    "tpu.trace_stop"() : () -> ()
    %30 = vector.shape_cast %29 : vector<2x16x8xf32> to vector<32x8xf32>
    %c0_13 = arith.constant 0 : index
    %c0_14 = arith.constant 0 : index
    %31 = vector.load %arg3[%c0_13, %c0_14] : memref<8x128xf32, #tpu.memory_space<vmem>>, vector<8x128xf32>
    %cst_15 = arith.constant dense<0.000000e+00> : vector<32x128xf32>
    %32 = tpu.matmul %30, %31, %cst_15 {dimension_numbers = #tpu.dot_dimension_numbers<[1], [0], [0], [1], [0, 0, 1, 1], [], []>} : vector<32x8xf32>, vector<8x128xf32>, vector<32x128xf32> -> vector<32x128xf32>
    %c0_16 = arith.constant 0 : index
    %c0_17 = arith.constant 0 : index
    %33 = vector.load %arg4[%c0_16, %c0_17] : memref<1x128xf32, #tpu.memory_space<vmem>>, vector<1x128xf32>
    %34 = vector.broadcast %33 : vector<1x128xf32> to vector<32x128xf32>
    %35 = arith.addf %32, %34 : vector<32x128xf32>
    %cst_18 = arith.constant 0.000000e+00 : f32
    %36 = vector.broadcast %cst_18 : f32 to vector<32x128xf32>
    %37 = arith.maximumf %35, %36 : vector<32x128xf32>
    %38 = arith.negf %37 : vector<32x128xf32>
    %39 = math.exp %38 : vector<32x128xf32>
    %cst_19 = arith.constant 1.000000e+00 : f32
    %40 = vector.broadcast %cst_19 : f32 to vector<32x128xf32>
    %41 = arith.addf %40, %39 : vector<32x128xf32>
    %42 = arith.divf %40, %41 : vector<32x128xf32>
    %43 = arith.mulf %37, %42 : vector<32x128xf32>
    %cst_20 = arith.constant -2.200000e+00 : f32
    %44 = vector.broadcast %cst_20 : f32 to vector<32x128xf32>
    %45 = arith.cmpf oge, %37, %44 : vector<32x128xf32>
    %cst_21 = arith.constant -1.800000e+00 : f32
    %46 = vector.broadcast %cst_21 : f32 to vector<32x128xf32>
    %47 = arith.cmpf olt, %37, %46 : vector<32x128xf32>
    %48 = arith.andi %45, %47 : vector<32x128xi1>
    %cst_22 = arith.constant 1.000000e+00 : f32
    %cst_23 = arith.constant 0.000000e+00 : f32
    %49 = vector.broadcast %cst_22 : f32 to vector<32x128xf32>
    %50 = vector.broadcast %cst_23 : f32 to vector<32x128xf32>
    %51 = arith.select %48, %49, %50 : vector<32x128xi1>, vector<32x128xf32>
    %cst_24 = arith.constant -1.800000e+00 : f32
    %52 = vector.broadcast %cst_24 : f32 to vector<32x128xf32>
    %53 = arith.cmpf oge, %37, %52 : vector<32x128xf32>
    %cst_25 = arith.constant -1.400000e+00 : f32
    %54 = vector.broadcast %cst_25 : f32 to vector<32x128xf32>
    %55 = arith.cmpf olt, %37, %54 : vector<32x128xf32>
    %56 = arith.andi %53, %55 : vector<32x128xi1>
    %cst_26 = arith.constant 1.000000e+00 : f32
    %cst_27 = arith.constant 0.000000e+00 : f32
    %57 = vector.broadcast %cst_26 : f32 to vector<32x128xf32>
    %58 = vector.broadcast %cst_27 : f32 to vector<32x128xf32>
    %59 = arith.select %56, %57, %58 : vector<32x128xi1>, vector<32x128xf32>
    %cst_28 = arith.constant -1.400000e+00 : f32
    %60 = vector.broadcast %cst_28 : f32 to vector<32x128xf32>
    %61 = arith.cmpf oge, %37, %60 : vector<32x128xf32>
    %cst_29 = arith.constant -1.000000e+00 : f32
    %62 = vector.broadcast %cst_29 : f32 to vector<32x128xf32>
    %63 = arith.cmpf olt, %37, %62 : vector<32x128xf32>
    %64 = arith.andi %61, %63 : vector<32x128xi1>
    %cst_30 = arith.constant 1.000000e+00 : f32
    %cst_31 = arith.constant 0.000000e+00 : f32
    %65 = vector.broadcast %cst_30 : f32 to vector<32x128xf32>
    %66 = vector.broadcast %cst_31 : f32 to vector<32x128xf32>
    %67 = arith.select %64, %65, %66 : vector<32x128xi1>, vector<32x128xf32>
    %cst_32 = arith.constant -1.000000e+00 : f32
    %68 = vector.broadcast %cst_32 : f32 to vector<32x128xf32>
    %69 = arith.cmpf oge, %37, %68 : vector<32x128xf32>
    %cst_33 = arith.constant -6.000000e-01 : f32
    %70 = vector.broadcast %cst_33 : f32 to vector<32x128xf32>
    %71 = arith.cmpf olt, %37, %70 : vector<32x128xf32>
    %72 = arith.andi %69, %71 : vector<32x128xi1>
    %cst_34 = arith.constant 1.000000e+00 : f32
    %cst_35 = arith.constant 0.000000e+00 : f32
    %73 = vector.broadcast %cst_34 : f32 to vector<32x128xf32>
    %74 = vector.broadcast %cst_35 : f32 to vector<32x128xf32>
    %75 = arith.select %72, %73, %74 : vector<32x128xi1>, vector<32x128xf32>
    %cst_36 = arith.constant -6.000000e-01 : f32
    %76 = vector.broadcast %cst_36 : f32 to vector<32x128xf32>
    %77 = arith.cmpf oge, %37, %76 : vector<32x128xf32>
    %cst_37 = arith.constant -2.000000e-01 : f32
    %78 = vector.broadcast %cst_37 : f32 to vector<32x128xf32>
    %79 = arith.cmpf olt, %37, %78 : vector<32x128xf32>
    %80 = arith.andi %77, %79 : vector<32x128xi1>
    %cst_38 = arith.constant 1.000000e+00 : f32
    %cst_39 = arith.constant 0.000000e+00 : f32
    %81 = vector.broadcast %cst_38 : f32 to vector<32x128xf32>
    %82 = vector.broadcast %cst_39 : f32 to vector<32x128xf32>
    %83 = arith.select %80, %81, %82 : vector<32x128xi1>, vector<32x128xf32>
    %cst_40 = arith.constant -2.000000e-01 : f32
    %84 = vector.broadcast %cst_40 : f32 to vector<32x128xf32>
    %85 = arith.cmpf oge, %37, %84 : vector<32x128xf32>
    %cst_41 = arith.constant 2.000000e-01 : f32
    %86 = vector.broadcast %cst_41 : f32 to vector<32x128xf32>
    %87 = arith.cmpf olt, %37, %86 : vector<32x128xf32>
    %88 = arith.andi %85, %87 : vector<32x128xi1>
    %cst_42 = arith.constant 1.000000e+00 : f32
    %cst_43 = arith.constant 0.000000e+00 : f32
    %89 = vector.broadcast %cst_42 : f32 to vector<32x128xf32>
    %90 = vector.broadcast %cst_43 : f32 to vector<32x128xf32>
    %91 = arith.select %88, %89, %90 : vector<32x128xi1>, vector<32x128xf32>
    %cst_44 = arith.constant 2.000000e-01 : f32
    %92 = vector.broadcast %cst_44 : f32 to vector<32x128xf32>
    %93 = arith.cmpf oge, %37, %92 : vector<32x128xf32>
    %cst_45 = arith.constant 6.000000e-01 : f32
    %94 = vector.broadcast %cst_45 : f32 to vector<32x128xf32>
    %95 = arith.cmpf olt, %37, %94 : vector<32x128xf32>
    %96 = arith.andi %93, %95 : vector<32x128xi1>
    %cst_46 = arith.constant 1.000000e+00 : f32
    %cst_47 = arith.constant 0.000000e+00 : f32
    %97 = vector.broadcast %cst_46 : f32 to vector<32x128xf32>
    %98 = vector.broadcast %cst_47 : f32 to vector<32x128xf32>
    %99 = arith.select %96, %97, %98 : vector<32x128xi1>, vector<32x128xf32>
    %cst_48 = arith.constant 6.000000e-01 : f32
    %100 = vector.broadcast %cst_48 : f32 to vector<32x128xf32>
    %101 = arith.cmpf oge, %37, %100 : vector<32x128xf32>
    %cst_49 = arith.constant 1.000000e+00 : f32
    %102 = vector.broadcast %cst_49 : f32 to vector<32x128xf32>
    %103 = arith.cmpf olt, %37, %102 : vector<32x128xf32>
    %104 = arith.andi %101, %103 : vector<32x128xi1>
    %cst_50 = arith.constant 1.000000e+00 : f32
    %cst_51 = arith.constant 0.000000e+00 : f32
    %105 = vector.broadcast %cst_50 : f32 to vector<32x128xf32>
    %106 = vector.broadcast %cst_51 : f32 to vector<32x128xf32>
    %107 = arith.select %104, %105, %106 : vector<32x128xi1>, vector<32x128xf32>
    %cst_52 = arith.constant 1.000000e+00 : f32
    %108 = vector.broadcast %cst_52 : f32 to vector<32x128xf32>
    %109 = arith.cmpf oge, %37, %108 : vector<32x128xf32>
    %cst_53 = arith.constant 1.400000e+00 : f32
    %110 = vector.broadcast %cst_53 : f32 to vector<32x128xf32>
    %111 = arith.cmpf olt, %37, %110 : vector<32x128xf32>
    %112 = arith.andi %109, %111 : vector<32x128xi1>
    %cst_54 = arith.constant 1.000000e+00 : f32
    %cst_55 = arith.constant 0.000000e+00 : f32
    %113 = vector.broadcast %cst_54 : f32 to vector<32x128xf32>
    %114 = vector.broadcast %cst_55 : f32 to vector<32x128xf32>
    %115 = arith.select %112, %113, %114 : vector<32x128xi1>, vector<32x128xf32>
    %cst_56 = arith.constant 1.400000e+00 : f32
    %116 = vector.broadcast %cst_56 : f32 to vector<32x128xf32>
    %117 = arith.cmpf oge, %37, %116 : vector<32x128xf32>
    %cst_57 = arith.constant 1.800000e+00 : f32
    %118 = vector.broadcast %cst_57 : f32 to vector<32x128xf32>
    %119 = arith.cmpf olt, %37, %118 : vector<32x128xf32>
    %120 = arith.andi %117, %119 : vector<32x128xi1>
    %cst_58 = arith.constant 1.000000e+00 : f32
    %cst_59 = arith.constant 0.000000e+00 : f32
    %121 = vector.broadcast %cst_58 : f32 to vector<32x128xf32>
    %122 = vector.broadcast %cst_59 : f32 to vector<32x128xf32>
    %123 = arith.select %120, %121, %122 : vector<32x128xi1>, vector<32x128xf32>
    %cst_60 = arith.constant 1.800000e+00 : f32
    %124 = vector.broadcast %cst_60 : f32 to vector<32x128xf32>
    %125 = arith.cmpf oge, %37, %124 : vector<32x128xf32>
    %cst_61 = arith.constant 2.200000e+00 : f32
    %126 = vector.broadcast %cst_61 : f32 to vector<32x128xf32>
    %127 = arith.cmpf olt, %37, %126 : vector<32x128xf32>
    %128 = arith.andi %125, %127 : vector<32x128xi1>
    %cst_62 = arith.constant 1.000000e+00 : f32
    %cst_63 = arith.constant 0.000000e+00 : f32
    %129 = vector.broadcast %cst_62 : f32 to vector<32x128xf32>
    %130 = vector.broadcast %cst_63 : f32 to vector<32x128xf32>
    %131 = arith.select %128, %129, %130 : vector<32x128xi1>, vector<32x128xf32>
    %cst_64 = arith.constant -2.200000e+00 : f32
    %132 = vector.broadcast %cst_64 : f32 to vector<32x128xf32>
    %133 = arith.subf %37, %132 : vector<32x128xf32>
    %cst_65 = arith.constant 2.500000e+00 : f32
    %134 = vector.broadcast %cst_65 : f32 to vector<32x128xf32>
    %135 = arith.mulf %133, %134 : vector<32x128xf32>
    %cst_66 = arith.constant -1.400000e+00 : f32
    %136 = vector.broadcast %cst_66 : f32 to vector<32x128xf32>
    %137 = arith.subf %136, %37 : vector<32x128xf32>
    %cst_67 = arith.constant 2.500000e+00 : f32
    %138 = vector.broadcast %cst_67 : f32 to vector<32x128xf32>
    %139 = arith.mulf %137, %138 : vector<32x128xf32>
    %140 = arith.mulf %135, %51 : vector<32x128xf32>
    %141 = arith.mulf %139, %59 : vector<32x128xf32>
    %142 = arith.addf %140, %141 : vector<32x128xf32>
    %cst_68 = arith.constant -1.800000e+00 : f32
    %143 = vector.broadcast %cst_68 : f32 to vector<32x128xf32>
    %144 = arith.subf %37, %143 : vector<32x128xf32>
    %cst_69 = arith.constant 2.500000e+00 : f32
    %145 = vector.broadcast %cst_69 : f32 to vector<32x128xf32>
    %146 = arith.mulf %144, %145 : vector<32x128xf32>
    %cst_70 = arith.constant -1.000000e+00 : f32
    %147 = vector.broadcast %cst_70 : f32 to vector<32x128xf32>
    %148 = arith.subf %147, %37 : vector<32x128xf32>
    %cst_71 = arith.constant 2.500000e+00 : f32
    %149 = vector.broadcast %cst_71 : f32 to vector<32x128xf32>
    %150 = arith.mulf %148, %149 : vector<32x128xf32>
    %151 = arith.mulf %146, %59 : vector<32x128xf32>
    %152 = arith.mulf %150, %67 : vector<32x128xf32>
    %153 = arith.addf %151, %152 : vector<32x128xf32>
    %cst_72 = arith.constant -1.400000e+00 : f32
    %154 = vector.broadcast %cst_72 : f32 to vector<32x128xf32>
    %155 = arith.subf %37, %154 : vector<32x128xf32>
    %cst_73 = arith.constant 2.500000e+00 : f32
    %156 = vector.broadcast %cst_73 : f32 to vector<32x128xf32>
    %157 = arith.mulf %155, %156 : vector<32x128xf32>
    %cst_74 = arith.constant -6.000000e-01 : f32
    %158 = vector.broadcast %cst_74 : f32 to vector<32x128xf32>
    %159 = arith.subf %158, %37 : vector<32x128xf32>
    %cst_75 = arith.constant 2.500000e+00 : f32
    %160 = vector.broadcast %cst_75 : f32 to vector<32x128xf32>
    %161 = arith.mulf %159, %160 : vector<32x128xf32>
    %162 = arith.mulf %157, %67 : vector<32x128xf32>
    %163 = arith.mulf %161, %75 : vector<32x128xf32>
    %164 = arith.addf %162, %163 : vector<32x128xf32>
    %cst_76 = arith.constant -1.000000e+00 : f32
    %165 = vector.broadcast %cst_76 : f32 to vector<32x128xf32>
    %166 = arith.subf %37, %165 : vector<32x128xf32>
    %cst_77 = arith.constant 2.500000e+00 : f32
    %167 = vector.broadcast %cst_77 : f32 to vector<32x128xf32>
    %168 = arith.mulf %166, %167 : vector<32x128xf32>
    %cst_78 = arith.constant -2.000000e-01 : f32
    %169 = vector.broadcast %cst_78 : f32 to vector<32x128xf32>
    %170 = arith.subf %169, %37 : vector<32x128xf32>
    %cst_79 = arith.constant 2.500000e+00 : f32
    %171 = vector.broadcast %cst_79 : f32 to vector<32x128xf32>
    %172 = arith.mulf %170, %171 : vector<32x128xf32>
    %173 = arith.mulf %168, %75 : vector<32x128xf32>
    %174 = arith.mulf %172, %83 : vector<32x128xf32>
    %175 = arith.addf %173, %174 : vector<32x128xf32>
    %cst_80 = arith.constant -6.000000e-01 : f32
    %176 = vector.broadcast %cst_80 : f32 to vector<32x128xf32>
    %177 = arith.subf %37, %176 : vector<32x128xf32>
    %cst_81 = arith.constant 2.500000e+00 : f32
    %178 = vector.broadcast %cst_81 : f32 to vector<32x128xf32>
    %179 = arith.mulf %177, %178 : vector<32x128xf32>
    %cst_82 = arith.constant 2.000000e-01 : f32
    %180 = vector.broadcast %cst_82 : f32 to vector<32x128xf32>
    %181 = arith.subf %180, %37 : vector<32x128xf32>
    %cst_83 = arith.constant 2.500000e+00 : f32
    %182 = vector.broadcast %cst_83 : f32 to vector<32x128xf32>
    %183 = arith.mulf %181, %182 : vector<32x128xf32>
    %184 = arith.mulf %179, %83 : vector<32x128xf32>
    %185 = arith.mulf %183, %91 : vector<32x128xf32>
    %186 = arith.addf %184, %185 : vector<32x128xf32>
    %cst_84 = arith.constant -2.000000e-01 : f32
    %187 = vector.broadcast %cst_84 : f32 to vector<32x128xf32>
    %188 = arith.subf %37, %187 : vector<32x128xf32>
    %cst_85 = arith.constant 2.500000e+00 : f32
    %189 = vector.broadcast %cst_85 : f32 to vector<32x128xf32>
    %190 = arith.mulf %188, %189 : vector<32x128xf32>
    %cst_86 = arith.constant 6.000000e-01 : f32
    %191 = vector.broadcast %cst_86 : f32 to vector<32x128xf32>
    %192 = arith.subf %191, %37 : vector<32x128xf32>
    %cst_87 = arith.constant 2.500000e+00 : f32
    %193 = vector.broadcast %cst_87 : f32 to vector<32x128xf32>
    %194 = arith.mulf %192, %193 : vector<32x128xf32>
    %195 = arith.mulf %190, %91 : vector<32x128xf32>
    %196 = arith.mulf %194, %99 : vector<32x128xf32>
    %197 = arith.addf %195, %196 : vector<32x128xf32>
    %cst_88 = arith.constant 2.000000e-01 : f32
    %198 = vector.broadcast %cst_88 : f32 to vector<32x128xf32>
    %199 = arith.subf %37, %198 : vector<32x128xf32>
    %cst_89 = arith.constant 2.500000e+00 : f32
    %200 = vector.broadcast %cst_89 : f32 to vector<32x128xf32>
    %201 = arith.mulf %199, %200 : vector<32x128xf32>
    %cst_90 = arith.constant 1.000000e+00 : f32
    %202 = vector.broadcast %cst_90 : f32 to vector<32x128xf32>
    %203 = arith.subf %202, %37 : vector<32x128xf32>
    %cst_91 = arith.constant 2.500000e+00 : f32
    %204 = vector.broadcast %cst_91 : f32 to vector<32x128xf32>
    %205 = arith.mulf %203, %204 : vector<32x128xf32>
    %206 = arith.mulf %201, %99 : vector<32x128xf32>
    %207 = arith.mulf %205, %107 : vector<32x128xf32>
    %208 = arith.addf %206, %207 : vector<32x128xf32>
    %cst_92 = arith.constant 6.000000e-01 : f32
    %209 = vector.broadcast %cst_92 : f32 to vector<32x128xf32>
    %210 = arith.subf %37, %209 : vector<32x128xf32>
    %cst_93 = arith.constant 2.500000e+00 : f32
    %211 = vector.broadcast %cst_93 : f32 to vector<32x128xf32>
    %212 = arith.mulf %210, %211 : vector<32x128xf32>
    %cst_94 = arith.constant 1.400000e+00 : f32
    %213 = vector.broadcast %cst_94 : f32 to vector<32x128xf32>
    %214 = arith.subf %213, %37 : vector<32x128xf32>
    %cst_95 = arith.constant 2.500000e+00 : f32
    %215 = vector.broadcast %cst_95 : f32 to vector<32x128xf32>
    %216 = arith.mulf %214, %215 : vector<32x128xf32>
    %217 = arith.mulf %212, %107 : vector<32x128xf32>
    %218 = arith.mulf %216, %115 : vector<32x128xf32>
    %219 = arith.addf %217, %218 : vector<32x128xf32>
    %cst_96 = arith.constant 1.000000e+00 : f32
    %220 = vector.broadcast %cst_96 : f32 to vector<32x128xf32>
    %221 = arith.subf %37, %220 : vector<32x128xf32>
    %cst_97 = arith.constant 2.500000e+00 : f32
    %222 = vector.broadcast %cst_97 : f32 to vector<32x128xf32>
    %223 = arith.mulf %221, %222 : vector<32x128xf32>
    %cst_98 = arith.constant 1.800000e+00 : f32
    %224 = vector.broadcast %cst_98 : f32 to vector<32x128xf32>
    %225 = arith.subf %224, %37 : vector<32x128xf32>
    %cst_99 = arith.constant 2.500000e+00 : f32
    %226 = vector.broadcast %cst_99 : f32 to vector<32x128xf32>
    %227 = arith.mulf %225, %226 : vector<32x128xf32>
    %228 = arith.mulf %223, %115 : vector<32x128xf32>
    %229 = arith.mulf %227, %123 : vector<32x128xf32>
    %230 = arith.addf %228, %229 : vector<32x128xf32>
    %cst_100 = arith.constant 1.400000e+00 : f32
    %231 = vector.broadcast %cst_100 : f32 to vector<32x128xf32>
    %232 = arith.subf %37, %231 : vector<32x128xf32>
    %cst_101 = arith.constant 2.500000e+00 : f32
    %233 = vector.broadcast %cst_101 : f32 to vector<32x128xf32>
    %234 = arith.mulf %232, %233 : vector<32x128xf32>
    %cst_102 = arith.constant 2.200000e+00 : f32
    %235 = vector.broadcast %cst_102 : f32 to vector<32x128xf32>
    %236 = arith.subf %235, %37 : vector<32x128xf32>
    %cst_103 = arith.constant 2.500000e+00 : f32
    %237 = vector.broadcast %cst_103 : f32 to vector<32x128xf32>
    %238 = arith.mulf %236, %237 : vector<32x128xf32>
    %239 = arith.mulf %234, %123 : vector<32x128xf32>
    %240 = arith.mulf %238, %131 : vector<32x128xf32>
    %241 = arith.addf %239, %240 : vector<32x128xf32>
    %cst_104 = arith.constant -2.200000e+00 : f32
    %242 = vector.broadcast %cst_104 : f32 to vector<32x128xf32>
    %243 = arith.subf %37, %242 : vector<32x128xf32>
    %cst_105 = arith.constant 1.250000e+00 : f32
    %244 = vector.broadcast %cst_105 : f32 to vector<32x128xf32>
    %245 = arith.mulf %243, %244 : vector<32x128xf32>
    %cst_106 = arith.constant -1.000000e+00 : f32
    %246 = vector.broadcast %cst_106 : f32 to vector<32x128xf32>
    %247 = arith.subf %246, %37 : vector<32x128xf32>
    %cst_107 = arith.constant 1.250000e+00 : f32
    %248 = vector.broadcast %cst_107 : f32 to vector<32x128xf32>
    %249 = arith.mulf %247, %248 : vector<32x128xf32>
    %250 = arith.mulf %245, %142 : vector<32x128xf32>
    %251 = arith.mulf %249, %153 : vector<32x128xf32>
    %252 = arith.addf %250, %251 : vector<32x128xf32>
    %cst_108 = arith.constant -1.800000e+00 : f32
    %253 = vector.broadcast %cst_108 : f32 to vector<32x128xf32>
    %254 = arith.subf %37, %253 : vector<32x128xf32>
    %cst_109 = arith.constant 1.250000e+00 : f32
    %255 = vector.broadcast %cst_109 : f32 to vector<32x128xf32>
    %256 = arith.mulf %254, %255 : vector<32x128xf32>
    %cst_110 = arith.constant -6.000000e-01 : f32
    %257 = vector.broadcast %cst_110 : f32 to vector<32x128xf32>
    %258 = arith.subf %257, %37 : vector<32x128xf32>
    %cst_111 = arith.constant 1.250000e+00 : f32
    %259 = vector.broadcast %cst_111 : f32 to vector<32x128xf32>
    %260 = arith.mulf %258, %259 : vector<32x128xf32>
    %261 = arith.mulf %256, %153 : vector<32x128xf32>
    %262 = arith.mulf %260, %164 : vector<32x128xf32>
    %263 = arith.addf %261, %262 : vector<32x128xf32>
    %cst_112 = arith.constant -1.400000e+00 : f32
    %264 = vector.broadcast %cst_112 : f32 to vector<32x128xf32>
    %265 = arith.subf %37, %264 : vector<32x128xf32>
    %cst_113 = arith.constant 1.250000e+00 : f32
    %266 = vector.broadcast %cst_113 : f32 to vector<32x128xf32>
    %267 = arith.mulf %265, %266 : vector<32x128xf32>
    %cst_114 = arith.constant -2.000000e-01 : f32
    %268 = vector.broadcast %cst_114 : f32 to vector<32x128xf32>
    %269 = arith.subf %268, %37 : vector<32x128xf32>
    %cst_115 = arith.constant 1.250000e+00 : f32
    %270 = vector.broadcast %cst_115 : f32 to vector<32x128xf32>
    %271 = arith.mulf %269, %270 : vector<32x128xf32>
    %272 = arith.mulf %267, %164 : vector<32x128xf32>
    %273 = arith.mulf %271, %175 : vector<32x128xf32>
    %274 = arith.addf %272, %273 : vector<32x128xf32>
    %cst_116 = arith.constant -1.000000e+00 : f32
    %275 = vector.broadcast %cst_116 : f32 to vector<32x128xf32>
    %276 = arith.subf %37, %275 : vector<32x128xf32>
    %cst_117 = arith.constant 1.250000e+00 : f32
    %277 = vector.broadcast %cst_117 : f32 to vector<32x128xf32>
    %278 = arith.mulf %276, %277 : vector<32x128xf32>
    %cst_118 = arith.constant 2.000000e-01 : f32
    %279 = vector.broadcast %cst_118 : f32 to vector<32x128xf32>
    %280 = arith.subf %279, %37 : vector<32x128xf32>
    %cst_119 = arith.constant 1.250000e+00 : f32
    %281 = vector.broadcast %cst_119 : f32 to vector<32x128xf32>
    %282 = arith.mulf %280, %281 : vector<32x128xf32>
    %283 = arith.mulf %278, %175 : vector<32x128xf32>
    %284 = arith.mulf %282, %186 : vector<32x128xf32>
    %285 = arith.addf %283, %284 : vector<32x128xf32>
    %cst_120 = arith.constant -6.000000e-01 : f32
    %286 = vector.broadcast %cst_120 : f32 to vector<32x128xf32>
    %287 = arith.subf %37, %286 : vector<32x128xf32>
    %cst_121 = arith.constant 1.250000e+00 : f32
    %288 = vector.broadcast %cst_121 : f32 to vector<32x128xf32>
    %289 = arith.mulf %287, %288 : vector<32x128xf32>
    %cst_122 = arith.constant 6.000000e-01 : f32
    %290 = vector.broadcast %cst_122 : f32 to vector<32x128xf32>
    %291 = arith.subf %290, %37 : vector<32x128xf32>
    %cst_123 = arith.constant 1.250000e+00 : f32
    %292 = vector.broadcast %cst_123 : f32 to vector<32x128xf32>
    %293 = arith.mulf %291, %292 : vector<32x128xf32>
    %294 = arith.mulf %289, %186 : vector<32x128xf32>
    %295 = arith.mulf %293, %197 : vector<32x128xf32>
    %296 = arith.addf %294, %295 : vector<32x128xf32>
    %cst_124 = arith.constant -2.000000e-01 : f32
    %297 = vector.broadcast %cst_124 : f32 to vector<32x128xf32>
    %298 = arith.subf %37, %297 : vector<32x128xf32>
    %cst_125 = arith.constant 1.250000e+00 : f32
    %299 = vector.broadcast %cst_125 : f32 to vector<32x128xf32>
    %300 = arith.mulf %298, %299 : vector<32x128xf32>
    %cst_126 = arith.constant 1.000000e+00 : f32
    %301 = vector.broadcast %cst_126 : f32 to vector<32x128xf32>
    %302 = arith.subf %301, %37 : vector<32x128xf32>
    %cst_127 = arith.constant 1.250000e+00 : f32
    %303 = vector.broadcast %cst_127 : f32 to vector<32x128xf32>
    %304 = arith.mulf %302, %303 : vector<32x128xf32>
    %305 = arith.mulf %300, %197 : vector<32x128xf32>
    %306 = arith.mulf %304, %208 : vector<32x128xf32>
    %307 = arith.addf %305, %306 : vector<32x128xf32>
    %cst_128 = arith.constant 2.000000e-01 : f32
    %308 = vector.broadcast %cst_128 : f32 to vector<32x128xf32>
    %309 = arith.subf %37, %308 : vector<32x128xf32>
    %cst_129 = arith.constant 1.250000e+00 : f32
    %310 = vector.broadcast %cst_129 : f32 to vector<32x128xf32>
    %311 = arith.mulf %309, %310 : vector<32x128xf32>
    %cst_130 = arith.constant 1.400000e+00 : f32
    %312 = vector.broadcast %cst_130 : f32 to vector<32x128xf32>
    %313 = arith.subf %312, %37 : vector<32x128xf32>
    %cst_131 = arith.constant 1.250000e+00 : f32
    %314 = vector.broadcast %cst_131 : f32 to vector<32x128xf32>
    %315 = arith.mulf %313, %314 : vector<32x128xf32>
    %316 = arith.mulf %311, %208 : vector<32x128xf32>
    %317 = arith.mulf %315, %219 : vector<32x128xf32>
    %318 = arith.addf %316, %317 : vector<32x128xf32>
    %cst_132 = arith.constant 6.000000e-01 : f32
    %319 = vector.broadcast %cst_132 : f32 to vector<32x128xf32>
    %320 = arith.subf %37, %319 : vector<32x128xf32>
    %cst_133 = arith.constant 1.250000e+00 : f32
    %321 = vector.broadcast %cst_133 : f32 to vector<32x128xf32>
    %322 = arith.mulf %320, %321 : vector<32x128xf32>
    %cst_134 = arith.constant 1.800000e+00 : f32
    %323 = vector.broadcast %cst_134 : f32 to vector<32x128xf32>
    %324 = arith.subf %323, %37 : vector<32x128xf32>
    %cst_135 = arith.constant 1.250000e+00 : f32
    %325 = vector.broadcast %cst_135 : f32 to vector<32x128xf32>
    %326 = arith.mulf %324, %325 : vector<32x128xf32>
    %327 = arith.mulf %322, %219 : vector<32x128xf32>
    %328 = arith.mulf %326, %230 : vector<32x128xf32>
    %329 = arith.addf %327, %328 : vector<32x128xf32>
    %cst_136 = arith.constant 1.000000e+00 : f32
    %330 = vector.broadcast %cst_136 : f32 to vector<32x128xf32>
    %331 = arith.subf %37, %330 : vector<32x128xf32>
    %cst_137 = arith.constant 1.250000e+00 : f32
    %332 = vector.broadcast %cst_137 : f32 to vector<32x128xf32>
    %333 = arith.mulf %331, %332 : vector<32x128xf32>
    %cst_138 = arith.constant 2.200000e+00 : f32
    %334 = vector.broadcast %cst_138 : f32 to vector<32x128xf32>
    %335 = arith.subf %334, %37 : vector<32x128xf32>
    %cst_139 = arith.constant 1.250000e+00 : f32
    %336 = vector.broadcast %cst_139 : f32 to vector<32x128xf32>
    %337 = arith.mulf %335, %336 : vector<32x128xf32>
    %338 = arith.mulf %333, %230 : vector<32x128xf32>
    %339 = arith.mulf %337, %241 : vector<32x128xf32>
    %340 = arith.addf %338, %339 : vector<32x128xf32>
    %cst_140 = arith.constant -2.200000e+00 : f32
    %341 = vector.broadcast %cst_140 : f32 to vector<32x128xf32>
    %342 = arith.subf %37, %341 : vector<32x128xf32>
    %cst_141 = arith.constant 0.833333313 : f32
    %343 = vector.broadcast %cst_141 : f32 to vector<32x128xf32>
    %344 = arith.mulf %342, %343 : vector<32x128xf32>
    %cst_142 = arith.constant -6.000000e-01 : f32
    %345 = vector.broadcast %cst_142 : f32 to vector<32x128xf32>
    %346 = arith.subf %345, %37 : vector<32x128xf32>
    %cst_143 = arith.constant 0.833333313 : f32
    %347 = vector.broadcast %cst_143 : f32 to vector<32x128xf32>
    %348 = arith.mulf %346, %347 : vector<32x128xf32>
    %349 = arith.mulf %344, %252 : vector<32x128xf32>
    %350 = arith.mulf %348, %263 : vector<32x128xf32>
    %351 = arith.addf %349, %350 : vector<32x128xf32>
    %cst_144 = arith.constant -1.800000e+00 : f32
    %352 = vector.broadcast %cst_144 : f32 to vector<32x128xf32>
    %353 = arith.subf %37, %352 : vector<32x128xf32>
    %cst_145 = arith.constant 0.833333313 : f32
    %354 = vector.broadcast %cst_145 : f32 to vector<32x128xf32>
    %355 = arith.mulf %353, %354 : vector<32x128xf32>
    %cst_146 = arith.constant -2.000000e-01 : f32
    %356 = vector.broadcast %cst_146 : f32 to vector<32x128xf32>
    %357 = arith.subf %356, %37 : vector<32x128xf32>
    %cst_147 = arith.constant 0.833333313 : f32
    %358 = vector.broadcast %cst_147 : f32 to vector<32x128xf32>
    %359 = arith.mulf %357, %358 : vector<32x128xf32>
    %360 = arith.mulf %355, %263 : vector<32x128xf32>
    %361 = arith.mulf %359, %274 : vector<32x128xf32>
    %362 = arith.addf %360, %361 : vector<32x128xf32>
    %cst_148 = arith.constant -1.400000e+00 : f32
    %363 = vector.broadcast %cst_148 : f32 to vector<32x128xf32>
    %364 = arith.subf %37, %363 : vector<32x128xf32>
    %cst_149 = arith.constant 0.833333313 : f32
    %365 = vector.broadcast %cst_149 : f32 to vector<32x128xf32>
    %366 = arith.mulf %364, %365 : vector<32x128xf32>
    %cst_150 = arith.constant 2.000000e-01 : f32
    %367 = vector.broadcast %cst_150 : f32 to vector<32x128xf32>
    %368 = arith.subf %367, %37 : vector<32x128xf32>
    %cst_151 = arith.constant 0.833333313 : f32
    %369 = vector.broadcast %cst_151 : f32 to vector<32x128xf32>
    %370 = arith.mulf %368, %369 : vector<32x128xf32>
    %371 = arith.mulf %366, %274 : vector<32x128xf32>
    %372 = arith.mulf %370, %285 : vector<32x128xf32>
    %373 = arith.addf %371, %372 : vector<32x128xf32>
    %cst_152 = arith.constant -1.000000e+00 : f32
    %374 = vector.broadcast %cst_152 : f32 to vector<32x128xf32>
    %375 = arith.subf %37, %374 : vector<32x128xf32>
    %cst_153 = arith.constant 0.833333313 : f32
    %376 = vector.broadcast %cst_153 : f32 to vector<32x128xf32>
    %377 = arith.mulf %375, %376 : vector<32x128xf32>
    %cst_154 = arith.constant 6.000000e-01 : f32
    %378 = vector.broadcast %cst_154 : f32 to vector<32x128xf32>
    %379 = arith.subf %378, %37 : vector<32x128xf32>
    %cst_155 = arith.constant 0.833333313 : f32
    %380 = vector.broadcast %cst_155 : f32 to vector<32x128xf32>
    %381 = arith.mulf %379, %380 : vector<32x128xf32>
    %382 = arith.mulf %377, %285 : vector<32x128xf32>
    %383 = arith.mulf %381, %296 : vector<32x128xf32>
    %384 = arith.addf %382, %383 : vector<32x128xf32>
    %cst_156 = arith.constant -6.000000e-01 : f32
    %385 = vector.broadcast %cst_156 : f32 to vector<32x128xf32>
    %386 = arith.subf %37, %385 : vector<32x128xf32>
    %cst_157 = arith.constant 0.833333313 : f32
    %387 = vector.broadcast %cst_157 : f32 to vector<32x128xf32>
    %388 = arith.mulf %386, %387 : vector<32x128xf32>
    %cst_158 = arith.constant 1.000000e+00 : f32
    %389 = vector.broadcast %cst_158 : f32 to vector<32x128xf32>
    %390 = arith.subf %389, %37 : vector<32x128xf32>
    %cst_159 = arith.constant 0.833333313 : f32
    %391 = vector.broadcast %cst_159 : f32 to vector<32x128xf32>
    %392 = arith.mulf %390, %391 : vector<32x128xf32>
    %393 = arith.mulf %388, %296 : vector<32x128xf32>
    %394 = arith.mulf %392, %307 : vector<32x128xf32>
    %395 = arith.addf %393, %394 : vector<32x128xf32>
    %cst_160 = arith.constant -2.000000e-01 : f32
    %396 = vector.broadcast %cst_160 : f32 to vector<32x128xf32>
    %397 = arith.subf %37, %396 : vector<32x128xf32>
    %cst_161 = arith.constant 0.833333313 : f32
    %398 = vector.broadcast %cst_161 : f32 to vector<32x128xf32>
    %399 = arith.mulf %397, %398 : vector<32x128xf32>
    %cst_162 = arith.constant 1.400000e+00 : f32
    %400 = vector.broadcast %cst_162 : f32 to vector<32x128xf32>
    %401 = arith.subf %400, %37 : vector<32x128xf32>
    %cst_163 = arith.constant 0.833333313 : f32
    %402 = vector.broadcast %cst_163 : f32 to vector<32x128xf32>
    %403 = arith.mulf %401, %402 : vector<32x128xf32>
    %404 = arith.mulf %399, %307 : vector<32x128xf32>
    %405 = arith.mulf %403, %318 : vector<32x128xf32>
    %406 = arith.addf %404, %405 : vector<32x128xf32>
    %cst_164 = arith.constant 2.000000e-01 : f32
    %407 = vector.broadcast %cst_164 : f32 to vector<32x128xf32>
    %408 = arith.subf %37, %407 : vector<32x128xf32>
    %cst_165 = arith.constant 0.833333313 : f32
    %409 = vector.broadcast %cst_165 : f32 to vector<32x128xf32>
    %410 = arith.mulf %408, %409 : vector<32x128xf32>
    %cst_166 = arith.constant 1.800000e+00 : f32
    %411 = vector.broadcast %cst_166 : f32 to vector<32x128xf32>
    %412 = arith.subf %411, %37 : vector<32x128xf32>
    %cst_167 = arith.constant 0.833333313 : f32
    %413 = vector.broadcast %cst_167 : f32 to vector<32x128xf32>
    %414 = arith.mulf %412, %413 : vector<32x128xf32>
    %415 = arith.mulf %410, %318 : vector<32x128xf32>
    %416 = arith.mulf %414, %329 : vector<32x128xf32>
    %417 = arith.addf %415, %416 : vector<32x128xf32>
    %cst_168 = arith.constant 6.000000e-01 : f32
    %418 = vector.broadcast %cst_168 : f32 to vector<32x128xf32>
    %419 = arith.subf %37, %418 : vector<32x128xf32>
    %cst_169 = arith.constant 0.833333313 : f32
    %420 = vector.broadcast %cst_169 : f32 to vector<32x128xf32>
    %421 = arith.mulf %419, %420 : vector<32x128xf32>
    %cst_170 = arith.constant 2.200000e+00 : f32
    %422 = vector.broadcast %cst_170 : f32 to vector<32x128xf32>
    %423 = arith.subf %422, %37 : vector<32x128xf32>
    %cst_171 = arith.constant 0.833333313 : f32
    %424 = vector.broadcast %cst_171 : f32 to vector<32x128xf32>
    %425 = arith.mulf %423, %424 : vector<32x128xf32>
    %426 = arith.mulf %421, %329 : vector<32x128xf32>
    %427 = arith.mulf %425, %340 : vector<32x128xf32>
    %428 = arith.addf %426, %427 : vector<32x128xf32>
    %429 = arith.truncf %43 : vector<32x128xf32> to vector<32x128xbf16>
    %430 = arith.truncf %351 : vector<32x128xf32> to vector<32x128xbf16>
    %431 = arith.truncf %362 : vector<32x128xf32> to vector<32x128xbf16>
    %432 = arith.truncf %373 : vector<32x128xf32> to vector<32x128xbf16>
    %433 = arith.truncf %384 : vector<32x128xf32> to vector<32x128xbf16>
    %434 = arith.truncf %395 : vector<32x128xf32> to vector<32x128xbf16>
    %435 = arith.truncf %406 : vector<32x128xf32> to vector<32x128xbf16>
    %436 = arith.truncf %417 : vector<32x128xf32> to vector<32x128xbf16>
    %437 = arith.truncf %428 : vector<32x128xf32> to vector<32x128xbf16>
    %438 = tpu.concatenate %429, %430, %431, %432, %433, %434, %435, %436, %437 in 1 : vector<32x128xbf16>, vector<32x128xbf16>, vector<32x128xbf16>, vector<32x128xbf16>, vector<32x128xbf16>, vector<32x128xbf16>, vector<32x128xbf16>, vector<32x128xbf16>, vector<32x128xbf16> -> vector<32x1152xbf16>
    %c0_172 = arith.constant 0 : index
    %c0_173 = arith.constant 0 : index
    %439 = vector.load %arg5[%c0_172, %c0_173] : memref<1152x128xbf16, #tpu.memory_space<vmem>>, vector<1152x128xbf16>
    %cst_174 = arith.constant dense<0.000000e+00> : vector<32x128xf32>
    %440 = tpu.matmul %438, %439, %cst_174 {dimension_numbers = #tpu.dot_dimension_numbers<[1], [0], [0], [1], [0, 0, 1, 1], [], []>} : vector<32x1152xbf16>, vector<1152x128xbf16>, vector<32x128xf32> -> vector<32x128xf32>
    %441 = vector.shape_cast %440 : vector<32x128xf32> to vector<2x16x128xf32>
    %c0_175 = arith.constant 0 : index
    %c0_176 = arith.constant 0 : index
    %c0_177 = arith.constant 0 : index
    %442 = vector.load %arg6[%c0_175, %c0_176, %c0_177] : memref<2x16x128xf32, #tpu.memory_space<vmem>>, vector<2x16x128xf32>
    tpu.vector_store %arg6[%c0_175, %c0_176, %c0_177], %441 {strides = array<i32>} : memref<2x16x128xf32, #tpu.memory_space<vmem>>, vector<2x16x128xf32>,
    return
  }
  func.func @transform_0(%arg0: i32) -> (i32, i32, i32) {
    %c0_i32 = arith.constant 0 : i32
    %c0_i32_0 = arith.constant 0 : i32
    %c0_i32_1 = arith.constant 0 : i32
    return %arg0, %c0_i32, %c0_i32_0 : i32, i32, i32
  }
  func.func @transform_1(%arg0: i32) -> (i32, i32, i32) {
    %c0_i32 = arith.constant 0 : i32
    %c0_i32_0 = arith.constant 0 : i32
    %c0_i32_1 = arith.constant 0 : i32
    return %arg0, %c0_i32, %c0_i32_0 : i32, i32, i32
  }
  func.func @transform_2(%arg0: i32) -> (i32, i32) {
    %c0_i32 = arith.constant 0 : i32
    %c0_i32_0 = arith.constant 0 : i32
    %c0_i32_1 = arith.constant 0 : i32
    return %c0_i32, %c0_i32_0 : i32, i32
  }
  func.func @transform_3(%arg0: i32) -> (i32, i32) {
    %c0_i32 = arith.constant 0 : i32
    %c0_i32_0 = arith.constant 0 : i32
    %c0_i32_1 = arith.constant 0 : i32
    return %c0_i32, %c0_i32_0 : i32, i32
  }
  func.func @transform_4(%arg0: i32) -> (i32, i32) {
    %c0_i32 = arith.constant 0 : i32
    %c0_i32_0 = arith.constant 0 : i32
    %c0_i32_1 = arith.constant 0 : i32
    return %c0_i32, %c0_i32_0 : i32, i32
  }
  func.func @transform_5(%arg0: i32) -> (i32, i32, i32) {
    %c0_i32 = arith.constant 0 : i32
    %c0_i32_0 = arith.constant 0 : i32
    %c0_i32_1 = arith.constant 0 : i32
    return %arg0, %c0_i32, %c0_i32_0 : i32, i32, i32
  }
}

</mosaic_0001>

<bundles_post_ra>
// kernel: tpu_custom_call.1
= control target key start
LH: loop header
LB: loop body
LE: loop exit
PB: predicated region body
PF: predicated region fallthrough
CT: control target
= control target key end

     0   :  { %10 = vsyncpa [#allocation3], 0  ;;  %s3533_s0 = inlined_call_operand.vmem [shape: f32[2,16,8], index: 0, kind: input, shape index: {}]   ;;  %s3534_s1 = inlined_call_operand.vmem [shape: bf16[2,16,16], index: 1, kind: input, shape index: {}]   ;;  %s3535_s2 = inlined_call_operand.vmem [shape: f32[8,128], index: 2, kind: input, shape index: {}]   ;;  %s3536_s3 = inlined_call_operand.vmem [shape: f32[1,128], index: 3, kind: input, shape index: {}]   ;;  %s3537_s4 = inlined_call_operand.hbm [shape: bf16[1152,128], index: 4, kind: input, shape index: {}]   ;;  %s3538_s5 = inlined_call_operand.hbm [shape: f32[2,16,128], index: 5, kind: output, shape index: {}]  }
   0x1   :  { %11 = vsyncpa [#allocation4], 0  ;;  %s24_s20 = sshll.u32 %s3537_s4, 4  ;;  %s2638_s21 = smov [#allocation2]   ;;  %s25_s20 = int_to_ptr.hbm [resolvable:$true] %s24_s20 }
   0x2   :  { %s26_s22 = sshll.u32 %s2638_s21, 4  ;;  %s2639_s23 = smov 64   ;;  %s27_s22 = int_to_ptr.vmem [resolvable:$true] %s26_s22 }
   0x3   :  { %s2640_s24 = smov 4  }
   0x4   :  { %32 = dma.hbm_to_vmem [thread:$0]  %s25_s20, 9216, %s27_s22, [#allocation3], %s2639_s23, %s2639_s23, %s2640_s24  }
   0x5   :  { %2634 = dma.done.wait [#allocation3], 9216  }
   0x6   :  { %2635 = vsyncadd [#allocation3], 4294958080  ;;  %vm49_vm0 = vcmask 64512   ;;  %v38_v0 = vld [vmem:[%s3533_s0 + $0x8] sm:$0xff]  ;;  %v40_v1 = vld [vmem:[%s3533_s0 + $0x18] sm:$0xff]  ;;  %v128_v12 = vlaneseq  ;;  %vm133_vm1 = vcmask 130112  }
   0x7   :  { %v37_v2 = vld [vmem:[%s3533_s0] sm:$0xff]  ;;  %2113 = vmatpush.xpose.msk.msra.mxu0 %vm49_vm0, %v38_v0  ;;  %2117 = vmatpush.xpose.msk.msra.mxu1 %vm49_vm0, %v40_v1  ;;  %v39_v4 = vld [vmem:[%s3533_s0 + $0x10] sm:$0xff]  ;;  %v109_v8 = vmul.f32 %v38_v0, %v38_v0  ;;  %v111_v9 = vmul.f32 %v40_v1, %v40_v1  ;;  %v2545_v31 = vld [vmem:[%s3534_s1 + $0x8] sm:$0xff]   ;;  %v3539_v43 = vmov 0.0   ;;  %vm190_vm4 = vcmask 130048   ;;  %s2100_s15 = sshll.u32 %s3538_s5, 4  ;;  %s2101_s15 = int_to_ptr.hbm [resolvable:$true] %s2100_s15 }
   0x8   :  { %v108_v3 = vmul.f32 %v37_v2, %v37_v2  ;;  %v110_v5 = vmul.f32 %v39_v4, %v39_v4  ;;  %235 = vmatpush.msra.mxu2 %v38_v0  ;;  %264 = vmatpush.msra.mxu3 %v40_v1  ;;  %v129_v15 = vand.u32 127, %v128_v12  ;;  %v2538_v32 = vld [vmem:[%s3534_s1] sm:$0xff]   ;;  %v2543_v35 = vunpack.c.l.bf16 %v2545_v31  ;;  %s2643_s16 = smov 128   ;;  %s2644_s17 = smov 8  }
   0x9   :  { %v115_v10 = vsel %vm49_vm0, %v109_v8, 0.0  ;;  %v121_v11 = vsel %vm49_vm0, %v111_v9, 0.0  ;;  %v2539_v38 = vunpack.c.l.bf16 %v2538_v32  ;;  %v2544_v56 = vunpack.c.h.bf16 %v2545_v31  ;;  %v2485_v31 = vld [vmem:[#allocation2 + $0xa0] sm:$0xff] }
   0xa   :  { %v112_v6 = vsel %vm49_vm0, %v108_v3, 0.0  ;;  %v118_v7 = vsel %vm49_vm0, %v110_v5, 0.0  ;;  %236 = vmatpush.msra.mxu2 %v37_v2  ;;  %265 = vmatpush.msra.mxu3 %v39_v4  ;;  %v131_v16 = vadd.s32 4294967288, %v129_v15  ;;  %v2540_v57 = vunpack.c.h.bf16 %v2538_v32  ;;  %v2493_v32 = vld [vmem:[#allocation2 + $0xe0] sm:$0xff] }
   0xb   :  { %113 = vadd.xlane.f32.xlu0 %v112_v6  ;;  %2114 = vmatpush.xpose.msk.msra.mxu0 %vm49_vm0, %v37_v2 }
   0xc   :  { %2118 = vmatpush.xpose.msk.msra.mxu1 %vm49_vm0, %v39_v4  ;;  %119 = vadd.xlane.f32.xlu1 %v118_v7 }
   0xe   :  { %2115 = vmatmul.msk.f32.vlgmr.msra.gmra.mxu0 %vm49_vm0, %v37_v2 }
   0xf   :  { %2119 = vmatmul.msk.f32.vlgmr.msra.gmra.mxu1 %vm49_vm0, %v39_v4 }
  0x13   :  { %116 = vadd.xlane.f32.xlu0 %v115_v10 }
  0x14   :  { %122 = vadd.xlane.f32.xlu1 %v121_v11 }
  0x16   :  { %2116 = vmatmul.msk.f32.gmra.mxu0 %vm49_vm0, %v38_v0  ;;  %v273_v0 = vld [vmem:[%s3535_s2] sm:$0xff] }
  0x17   :  { %2120 = vmatmul.msk.f32.gmra.mxu1 %vm49_vm0, %v40_v1  ;;  %305 = vmatpush.msrb.mxu2 %v273_v0 }
  0x7e   :  { %v114_v13 = vpop.xlane.xlu0 %113 }
  0x7f   :  { %v120_v14 = vpop.xlane.xlu1 %119  ;;  %v130_v20 = vperm.slane %v114_v13, %v129_v15 }
  0x80   :  { %v135_v18 = vperm.slane %v120_v14, %v129_v15 }
  0x86   :  { %v117_v17 = vpop.xlane.xlu0 %116 }
  0x87   :  { %v132_v19 = vperm.slane %v117_v17, %v131_v16  ;;  %v123_v21 = vpop.xlane.xlu1 %122 }
  0x88   :  { %v136_v22 = vperm.slane %v123_v21, %v131_v16 }
  0x89   :  { %v134_v23 = vsel %vm133_vm1, %v132_v19, %v130_v20 }
  0x8a   :  { %v137_v24 = vsel %vm133_vm1, %v136_v22, %v135_v18  ;;  %v158_v28 = vadd.f32 %v134_v23, %v114_v13  ;;  %v159_v40 = vadd.f32 %v134_v23, %v117_v17  ;;  %v2488_v22 = vld [vmem:[#allocation2 + $0xb8] sm:$0xff] }
  0x8b   :  { %v160_v25 = vadd.f32 %v137_v24, %v120_v14  ;;  %v73_v26 = vpop.f32.mrf.mxu0  ;;  %v161_v39 = vadd.f32 %v137_v24, %v123_v21  ;;  %v2480_v21 = vld [vmem:[#allocation2 + $0x78] sm:$0xff]  ;;  %1957 = vmatpush.bf16.msrb.mxu1 %v2488_v22  ;;  %v2479_v24 = vld [vmem:[#allocation2 + $0x70] sm:$0xff] }
  0x8c   :  { %v102_v27 = vpop.f32.mrf.mxu1  ;;  %v162_v29 = vmul.f32 2.0, %v73_v26  ;;  %v2496_v23 = vld [vmem:[#allocation2 + $0xf8] sm:$0xff]  ;;  %1938 = vmatpush.bf16.msrb.mxu0 %v2480_v21  ;;  %v2495_v26 = vld [vmem:[#allocation2 + $0xf0] sm:$0xff] }
  0x8d   :  { %v164_v30 = vmul.f32 2.0, %v102_v27  ;;  %v2478_v27 = vld [vmem:[#allocation2 + $0x68] sm:$0xff] }
  0x8e   :  { %v166_v33 = vsub.f32 %v158_v28, %v162_v29  ;;  %v2486_v28 = vld [vmem:[#allocation2 + $0xa8] sm:$0xff] }
  0x8f   :  { %v168_v34 = vsub.f32 %v160_v25, %v164_v30  ;;  %v2487_v25 = vld [vmem:[#allocation2 + $0xb0] sm:$0xff]  ;;  %v2494_v29 = vld [vmem:[#allocation2 + $0xe8] sm:$0xff]  ;;  %v2477_v30 = vld [vmem:[#allocation2 + $0x60] sm:$0xff] }
  0x90   :  { %v170_v36 = vmax.f32 %v166_v33, 0.0  ;;  %1939 = vmatpush.bf16.msrb.mxu0 %v2479_v24  ;;  %1958 = vmatpush.bf16.msrb.mxu1 %v2487_v25  ;;  %v2472_v33 = vld [vmem:[#allocation2 + $0x38] sm:$0xff] }
  0x91   :  { %v172_v37 = vmax.f32 %v168_v34, 0.0  ;;  %1919 = vmatpush.bf16.msrb.mxu3 %v2472_v33  ;;  %v2476_v34 = vld [vmem:[#allocation2 + $0x58] sm:$0xff] }
  0x92   :  { %vm174_vm2 = vcmp.le.f32.partialorder %v170_v36, 0.25  ;;  %v2492_v36 = vld [vmem:[#allocation2 + $0xd8] sm:$0xff] }
  0x93   :  { %vm176_vm3 = vcmp.le.f32.partialorder %v172_v37, 0.25  ;;  %v76_v41 = vpop.f32.mrf.mxu0  ;;  %v2121_v45 = vsel %vm174_vm2, 1.0, %v3539_v43  ;;  %v2471_v37 = vld [vmem:[#allocation2 + $0x30] sm:$0xff] }
  0x94   :  { %v105_v42 = vpop.f32.mrf.mxu1  ;;  %v2123_v44 = vsel %vm176_vm3, 1.0, %v3539_v43  ;;  %v163_v46 = vmul.f32 2.0, %v76_v41  ;;  %v186_v49 = vmul.f32 %v2539_v38, %v2121_v45  ;;  %1940 = vmatpush.bf16.msrb.mxu0 %v2478_v27  ;;  %1959 = vmatpush.bf16.msrb.mxu1 %v2486_v28  ;;  %v2475_v38 = vld [vmem:[#allocation2 + $0x50] sm:$0xff]  ;;  %v2470_v41 = vld [vmem:[#allocation2 + $0x28] sm:$0xff] }
  0x95   :  { %v165_v47 = vmul.f32 2.0, %v105_v42  ;;  %v188_v48 = vmul.f32 %v2543_v35, %v2123_v44  ;;  %v2484_v35 = vld [vmem:[#allocation2 + $0x98] sm:$0xff]  ;;  %1920 = vmatpush.bf16.msrb.mxu3 %v2471_v37  ;;  %v2474_v42 = vld [vmem:[#allocation2 + $0x48] sm:$0xff] }
  0x96   :  { %v167_v50 = vsub.f32 %v159_v40, %v163_v46  ;;  %v191_v53 = vsel %vm190_vm4, %v186_v49, 0.0  ;;  %v2491_v40 = vld [vmem:[#allocation2 + $0xd0] sm:$0xff]  ;;  %v2482_v44 = vld [vmem:[#allocation2 + $0x88] sm:$0xff]  ;;  %v2469_v46 = vld [vmem:[#allocation2 + $0x20] sm:$0xff] }
  0x97   :  { %v169_v51 = vsub.f32 %v161_v39, %v165_v47  ;;  %v197_v52 = vsel %vm190_vm4, %v188_v48, 0.0  ;;  %192 = vadd.xlane.f32.xlu2 %v191_v53  ;;  %v2483_v39 = vld [vmem:[#allocation2 + $0x90] sm:$0xff]  ;;  %v2490_v45 = vld [vmem:[#allocation2 + $0xc8] sm:$0xff]  ;;  %v2473_v47 = vld [vmem:[#allocation2 + $0x40] sm:$0xff] }
  0x98   :  { %198 = vadd.xlane.f32.xlu0 %v197_v52  ;;  %v171_v54 = vmax.f32 %v167_v50, 0.0  ;;  %1941 = vmatpush.bf16.msrb.mxu0 %v2477_v30  ;;  %v2489_v50 = vld [vmem:[#allocation2 + $0xc0] sm:$0xff] }
  0x99   :  { %v173_v55 = vmax.f32 %v169_v51, 0.0  ;;  %1960 = vmatpush.bf16.msrb.mxu1 %v2485_v31  ;;  %1921 = vmatpush.bf16.msrb.mxu3 %v2470_v41  ;;  %v2468_v51 = vld [vmem:[#allocation2 + $0x18] sm:$0xff] }
  0x9a   :  { %vm175_vm5 = vcmp.le.f32.partialorder %v171_v54, 0.25 }
  0x9b   :  { %vm177_vm6 = vcmp.le.f32.partialorder %v173_v55, 0.25  ;;  %v2122_v59 = vsel %vm175_vm5, 1.0, %v3539_v43 }
  0x9c   :  { %v2124_v58 = vsel %vm177_vm6, 1.0, %v3539_v43  ;;  %v187_v61 = vmul.f32 %v2540_v57, %v2122_v59  ;;  %1942 = vmatpush.bf16.msrb.mxu0 %v2476_v34 }
  0x9d   :  { %v189_v60 = vmul.f32 %v2544_v56, %v2124_v58  ;;  %1961 = vmatpush.bf16.msrb.mxu1 %v2484_v35  ;;  %1922 = vmatpush.bf16.msrb.mxu3 %v2469_v46 }
  0x9e   :  { %v194_v63 = vsel %vm190_vm4, %v187_v61, 0.0 }
  0x9f   :  { %v200_v62 = vsel %vm190_vm4, %v189_v60, 0.0  ;;  %195 = vadd.xlane.f32.xlu2 %v194_v63 }
  0xa0   :  { %201 = vadd.xlane.f32.xlu1 %v200_v62  ;;  %1943 = vmatpush.bf16.msrb.mxu0 %v2475_v38 }
  0xa1   :  { %1962 = vmatpush.bf16.msrb.mxu1 %v2483_v39  ;;  %1923 = vmatpush.bf16.msrb.mxu3 %v2468_v51 }
  0xa4   :  { %1944 = vmatpush.bf16.msrb.mxu0 %v2474_v42 }
  0xa5   :  { %1963 = vmatpush.bf16.msrb.mxu1 %v2482_v44 }
  0xa8   :  { %1945 = vmatpush.bf16.msrb.mxu0 %v2473_v47 }
 0x10a   :  { %v193_v2 = vpop.xlane.xlu2 %192 }
 0x10b   :  { %v199_v1 = vpop.xlane.xlu0 %198  ;;  %v203_v4 = vadd.f32 1e-06, %v193_v2 }
 0x10c   :  { %v205_v3 = vadd.f32 1e-06, %v199_v1 }
 0x10e   :  { %2562 = vrcp.f32 %v205_v3 }
 0x10f   :  { %2564 = vrcp.f32 %v203_v4 }
 0x112   :  { %v196_v6 = vpop.xlane.xlu2 %195 }
 0x113   :  { %v202_v5 = vpop.xlane.xlu1 %201  ;;  %v204_v9 = vadd.f32 1e-06, %v196_v6 }
 0x114   :  { %v2563_v7 = vpop.eup %2562  ;;  %v206_v8 = vadd.f32 1e-06, %v202_v5 }
 0x115   :  { %v2565_v10 = vpop.eup %2564  ;;  %v213_v11 = vmul.f32 %v2563_v7, %v188_v48  ;;  %v2481_v48 = vld [vmem:[#allocation2 + $0x80] sm:$0xff] }
 0x116   :  { %2566 = vrcp.f32 %v206_v8  ;;  %v211_v12 = vmul.f32 %v2565_v10, %v186_v49  ;;  %v2730_v49 = vld [vmem:[%s3536_s3] ss:$0 sm:$0xff]  ;;  %1964 = vmatpush.bf16.msrb.mxu1 %v2481_v48  ;;  %s2642_s3 = smov [#allocation5]  }
 0x117   :  { %2568 = vrcp.f32 %v204_v9  ;;  %2127 = vmatmul.msk.f32.vlgmr.msra.gmra.mxu3 %vm190_vm4, %v213_v11  ;;  %s2098_s12 = sshll.u32 %s2642_s3, 4  ;;  %s2099_s12 = int_to_ptr.vmem [resolvable:$true] %s2098_s12 }
 0x118   :  { %2125 = vmatmul.msk.f32.vlgmr.msra.gmra.mxu2 %vm190_vm4, %v211_v12 }
 0x119   :  { %1976 = vmatpush.bf16.msra.mxu2 %v2496_v23 }
 0x11c   :  { %v2567_v13 = vpop.eup %2566 }
 0x11d   :  { %v2569_v14 = vpop.eup %2568  ;;  %v214_v15 = vmul.f32 %v2567_v13, %v189_v60  ;;  %1977 = vmatpush.bf16.msra.mxu2 %v2495_v26 }
 0x11e   :  { %v212_v16 = vmul.f32 %v2569_v14, %v187_v61 }
 0x11f   :  { %2128 = vmatmul.msk.f32.gmra.mxu3 %vm190_vm4, %v214_v15 }
 0x120   :  { %2126 = vmatmul.msk.f32.gmra.mxu2 %vm190_vm4, %v212_v16 }
 0x121   :  { %1978 = vmatpush.bf16.msra.mxu2 %v2494_v29 }
 0x125   :  { %1979 = vmatpush.bf16.msra.mxu2 %v2493_v32 }
 0x129   :  { %1980 = vmatpush.bf16.msra.mxu2 %v2492_v36 }
 0x12d   :  { %1981 = vmatpush.bf16.msra.mxu2 %v2491_v40 }
 0x131   :  { %1982 = vmatpush.bf16.msra.mxu2 %v2490_v45 }
 0x135   :  { %1983 = vmatpush.bf16.msra.mxu2 %v2489_v50 }
 0x19a   :  { %v267_v19 = vpop.f32.mrf.mxu3 }
 0x19b   :  { %v238_v17 = vpop.f32.mrf.mxu2 }
 0x19c   :  { %2129 = vmatmul.msk.f32.vlgmr.msrb.gmra.mxu2 %vm49_vm0, %v238_v17 }
 0x1a2   :  { %v270_v20 = vpop.f32.mrf.mxu3 }
 0x1a3   :  { %v241_v18 = vpop.f32.mrf.mxu2 }
 0x1a4   :  { %2130 = vmatmul.msk.f32.gmra.mxu2 %vm49_vm0, %v241_v18 }
 0x1ac   :  { %2131 = vmatmul.msk.f32.gmra.mxu2 %vm49_vm0, %v267_v19 }
 0x1b4   :  { %2132 = vmatmul.msk.f32.gmra.mxu2 %vm49_vm0, %v270_v20 }
 0x21f   :  { %v307_v52 = vpop.f32.mrf.mxu2 }
 0x220   :  { %v308_v53 = vadd.f32 %v2730_v49, %v307_v52 }
 0x222   :  { %v2733_v54 = vmax.f32 %v308_v53, 0.0 }
 0x224   :  { %vm403_vm7 = vcmp.ge.f32.partialorder %v2733_v54, -2.2  ;;  %vm407_vm8 = vcmp.lt.f32.partialorder %v2733_v54, -1.8  ;;  %vm419_vm9 = vcmp.ge.f32.partialorder %v2733_v54, -1.8 }
 0x225   :  { %vm411_vm10 = vmand %vm403_vm7, %vm407_vm8  ;;  %vm423_vm11 = vcmp.lt.f32.partialorder %v2733_v54, -1.4  ;;  %vm435_vm12 = vcmp.ge.f32.partialorder %v2733_v54, -1.4  ;;  %vm439_vm13 = vcmp.lt.f32.partialorder %v2733_v54, -1.0  ;;  %vm451_vm14 = vcmp.ge.f32.partialorder %v2733_v54, -1.0 }
 0x226   :  { %vm427_vm15 = vmand %vm419_vm9, %vm423_vm11  ;;  %vm455_vm0 = vcmp.lt.f32.partialorder %v2733_v54, -0.6  ;;  %v2744_v55 = vadd.f32 2.2, %v2733_v54  ;;  %v615_v56 = vsub.f32 -1.0, %v2733_v54  ;;  %v415_v58 = vsel %vm411_vm10, 1.0, %v3539_v43 }
 0x227   :  { %v310_v57 = vpop.f32.mrf.mxu2  ;;  %v431_v59 = vsel %vm427_vm15, 1.0, %v3539_v43  ;;  %vm443_vm1 = vmand %vm435_vm12, %vm439_vm13  ;;  %v587_v60 = vsub.f32 -1.4, %v2733_v54  ;;  %v2751_v61 = vadd.f32 1.8, %v2733_v54  ;;  %v2768_v8 = vadd.f32 1.0, %v2733_v54 }
 0x228   :  { %v311_v62 = vadd.f32 %v2730_v49, %v310_v57  ;;  %v447_v63 = vsel %vm443_vm1, 1.0, %v3539_v43  ;;  %vm459_vm2 = vmand %vm451_vm14, %vm455_vm0  ;;  %v583_v0 = vmul.f32 2.5, %v2744_v55  ;;  %v619_v1 = vmul.f32 2.5, %v615_v56 }
 0x229   :  { %v591_v2 = vmul.f32 2.5, %v587_v60  ;;  %v611_v3 = vmul.f32 2.5, %v2751_v61  ;;  %v2760_v4 = vadd.f32 1.4, %v2733_v54  ;;  %v2765_v6 = vsel %vm459_vm2, 1.0, %v3539_v43 }
 0x22a   :  { %v2762_v5 = vmax.f32 %v311_v62, 0.0  ;;  %v595_v7 = vmul.f32 %v583_v0, %v415_v58  ;;  %v627_v10 = vmul.f32 %v619_v1, %v447_v63  ;;  %v2772_v12 = vsub.f32 -0.6, %v2733_v54 }
 0x22b   :  { %v599_v9 = vmul.f32 %v591_v2, %v431_v59  ;;  %v639_v11 = vmul.f32 2.5, %v2760_v4  ;;  %v623_v13 = vmul.f32 %v611_v3, %v431_v59  ;;  %v859_v16 = vmul.f32 1.25, %v2744_v55 }
 0x22c   :  { %vm404_vm3 = vcmp.ge.f32.partialorder %v2762_v5, -2.2  ;;  %vm408_vm4 = vcmp.lt.f32.partialorder %v2762_v5, -1.8  ;;  %vm420_vm5 = vcmp.ge.f32.partialorder %v2762_v5, -1.8 }
 0x22d   :  { %vm412_vm6 = vmand %vm404_vm3, %vm408_vm4  ;;  %vm424_vm7 = vcmp.lt.f32.partialorder %v2762_v5, -1.4  ;;  %vm436_vm8 = vcmp.ge.f32.partialorder %v2762_v5, -1.4  ;;  %vm440_vm9 = vcmp.lt.f32.partialorder %v2762_v5, -1.0  ;;  %vm452_vm10 = vcmp.ge.f32.partialorder %v2762_v5, -1.0 }
 0x22e   :  { %v416_v14 = vsel %vm412_vm6, 1.0, %v3539_v43  ;;  %vm428_vm11 = vmand %vm420_vm5, %vm424_vm7  ;;  %vm456_vm12 = vcmp.lt.f32.partialorder %v2762_v5, -0.6  ;;  %v2138_v15 = vadd.f32 2.2, %v2762_v5  ;;  %v603_v19 = vadd.f32 %v599_v9, %v595_v7 }
 0x22f   :  { %v313_v17 = vpop.f32.mrf.mxu2  ;;  %vm444_vm13 = vmand %vm436_vm8, %vm440_vm9  ;;  %v588_v18 = vsub.f32 -1.4, %v2762_v5  ;;  %v2787_v20 = vadd.f32 1.8, %v2762_v5  ;;  %v616_v21 = vsub.f32 -1.0, %v2762_v5  ;;  %v432_v23 = vsel %vm428_vm11, 1.0, %v3539_v43 }
 0x230   :  { %v314_v22 = vadd.f32 %v2730_v49, %v313_v17  ;;  %v448_v24 = vsel %vm444_vm13, 1.0, %v3539_v43  ;;  %vm460_vm14 = vmand %vm452_vm10, %vm456_vm12  ;;  %v584_v25 = vmul.f32 2.5, %v2138_v15  ;;  %v631_v29 = vadd.f32 %v627_v10, %v623_v13 }
 0x231   :  { %v592_v26 = vmul.f32 2.5, %v588_v18  ;;  %v612_v27 = vmul.f32 2.5, %v2787_v20  ;;  %v620_v28 = vmul.f32 2.5, %v616_v21  ;;  %v2797_v30 = vsel %vm460_vm14, 1.0, %v3539_v43 }
 0x232   :  { %v596_v31 = vmul.f32 %v584_v25, %v416_v14  ;;  %v2800_v32 = vadd.f32 1.4, %v2762_v5  ;;  %v644_v33 = vsub.f32 -0.6, %v2762_v5  ;;  %v647_v37 = vmul.f32 2.5, %v2772_v12 }
 0x233   :  { %v600_v34 = vmul.f32 %v592_v26, %v432_v23  ;;  %v624_v35 = vmul.f32 %v612_v27, %v432_v23  ;;  %v628_v36 = vmul.f32 %v620_v28, %v448_v24  ;;  %v651_v40 = vmul.f32 %v639_v11, %v447_v63 }
 0x234   :  { %v640_v38 = vmul.f32 2.5, %v2800_v32  ;;  %v648_v39 = vmul.f32 2.5, %v644_v33  ;;  %v860_v41 = vmul.f32 1.25, %v2138_v15  ;;  %v655_v45 = vmul.f32 %v647_v37, %v2765_v6  ;;  %v2512_v37 = vld [vmem:[#allocation2 + $0x178] sm:$0xff] }
 0x235   :  { %v604_v42 = vadd.f32 %v600_v34, %v596_v31  ;;  %v632_v44 = vadd.f32 %v628_v36, %v624_v35  ;;  %v863_v46 = vmul.f32 1.25, %v615_v56  ;;  %v864_v50 = vmul.f32 1.25, %v616_v21  ;;  %2014 = vmatpush.bf16.msra.mxu0 %v2512_v37 }
 0x236   :  { %v652_v47 = vmul.f32 %v640_v38, %v448_v24  ;;  %v656_v48 = vmul.f32 %v648_v39, %v2797_v30  ;;  %v867_v51 = vmul.f32 %v859_v16, %v603_v19  ;;  %v2809_v53 = vadd.f32 %v655_v45, %v651_v40  ;;  %v2520_v38 = vld [vmem:[#allocation2 + $0x1b8] sm:$0xff]  ;;  %v2467_v45 = vld [vmem:[#allocation2 + $0x10] sm:$0xff] }
 0x237   :  { %v316_v52 = vpop.f32.mrf.mxu2  ;;  %v868_v57 = vmul.f32 %v860_v41, %v604_v42  ;;  %v871_v58 = vmul.f32 %v863_v46, %v631_v29  ;;  %v879_v59 = vmul.f32 1.25, %v2751_v61  ;;  %v2812_v60 = vmax.f32 %v314_v22, 0.0  ;;  %v2528_v39 = vld [vmem:[#allocation2 + $0x1f8] sm:$0xff]  ;;  %2033 = vmatpush.bf16.msra.mxu1 %v2520_v38  ;;  %1924 = vmatpush.bf16.msrb.mxu3 %v2467_v45 }
 0x238   :  { %v2814_v62 = vadd.f32 %v656_v48, %v652_v47  ;;  %v872_v63 = vmul.f32 %v864_v50, %v632_v44  ;;  %v880_v0 = vmul.f32 1.25, %v2787_v20  ;;  %v883_v1 = vmul.f32 1.25, %v2772_v12  ;;  %v2511_v50 = vld [vmem:[#allocation2 + $0x170] sm:$0xff]  ;;  %2052 = vmatpush.bf16.msrb.mxu2 %v2528_v39 }
 0x239   :  { %v875_v56 = vadd.f32 %v871_v58, %v867_v51  ;;  %v884_v2 = vmul.f32 1.25, %v644_v33  ;;  %v887_v3 = vmul.f32 %v879_v59, %v631_v29  ;;  %v317_v7 = vadd.f32 %v2730_v49, %v316_v52  ;;  %v2519_v51 = vld [vmem:[#allocation2 + $0x1b0] sm:$0xff]  ;;  %2015 = vmatpush.bf16.msra.mxu0 %v2511_v50 }
 0x23a   :  { %v876_v9 = vadd.f32 %v872_v63, %v868_v57  ;;  %v888_v10 = vmul.f32 %v880_v0, %v632_v44  ;;  %v1039_v11 = vmul.f32 0.8333333, %v2744_v55  ;;  %v891_v13 = vmul.f32 %v883_v1, %v2809_v53  ;;  %v2527_v59 = vld [vmem:[#allocation2 + $0x1f0] sm:$0xff]  ;;  %v2466_v63 = vld [vmem:[#allocation2 + $0x8] sm:$0xff] }
 0x23b   :  { %v892_v14 = vmul.f32 %v884_v2, %v2814_v62  ;;  %v1040_v16 = vmul.f32 0.8333333, %v2138_v15  ;;  %v1043_v17 = vmul.f32 0.8333333, %v2772_v12  ;;  %v1044_v18 = vmul.f32 0.8333333, %v644_v33  ;;  %2034 = vmatpush.bf16.msra.mxu1 %v2519_v51  ;;  %1925 = vmatpush.bf16.msrb.mxu3 %v2466_v63 }
 0x23c   :  { %v1047_v19 = vmul.f32 %v1039_v11, %v875_v56  ;;  %vm467_vm15 = vcmp.ge.f32.partialorder %v2733_v54, -0.6  ;;  %vm468_vm0 = vcmp.ge.f32.partialorder %v2762_v5, -0.6  ;;  %v2825_v21 = vadd.f32 %v891_v13, %v887_v3  ;;  %v2510_v11 = vld [vmem:[#allocation2 + $0x168] sm:$0xff]  ;;  %2053 = vmatpush.bf16.msrb.mxu2 %v2527_v59 }
 0x23d   :  { %v2827_v49 = vadd.f32 %v892_v14, %v888_v10  ;;  %v1048_v22 = vmul.f32 %v1040_v16, %v876_v9  ;;  %vm471_vm1 = vcmp.lt.f32.partialorder %v2733_v54, -0.2  ;;  %vm472_vm2 = vcmp.lt.f32.partialorder %v2762_v5, -0.2  ;;  %v2518_v13 = vld [vmem:[#allocation2 + $0x1a8] sm:$0xff]  ;;  %2016 = vmatpush.bf16.msra.mxu0 %v2510_v11 }
 0x23e   :  { %vm475_vm3 = vmand %vm467_vm15, %vm471_vm1  ;;  %v2832_v55 = vadd.f32 1.0, %v2762_v5  ;;  %v667_v12 = vmul.f32 2.5, %v2768_v8  ;;  %v671_v15 = vsub.f32 -0.2, %v2733_v54  ;;  %v1051_v23 = vmul.f32 %v1043_v17, %v2825_v21 }
 0x23f   :  { %v1052_v24 = vmul.f32 %v1044_v18, %v2827_v49  ;;  %vm476_vm4 = vmand %vm468_vm0, %vm472_vm2  ;;  %v479_v25 = vsel %vm475_vm3, 1.0, %v3539_v43  ;;  %v672_v26 = vsub.f32 -0.2, %v2762_v5  ;;  %v2846_v36 = vadd.f32 0.6, %v2733_v54  ;;  %2035 = vmatpush.bf16.msra.mxu1 %v2518_v13 }
 0x240   :  { %v2841_v27 = vsel %vm476_vm4, 1.0, %v3539_v43  ;;  %v668_v28 = vmul.f32 2.5, %v2832_v55  ;;  %v675_v29 = vmul.f32 2.5, %v671_v15  ;;  %v679_v31 = vmul.f32 %v667_v12, %v2765_v6 }
 0x241   :  { %v1055_v33 = vadd.f32 %v1051_v23, %v1047_v19  ;;  %v1056_v34 = vadd.f32 %v1052_v24, %v1048_v22  ;;  %v676_v35 = vmul.f32 2.5, %v672_v26  ;;  %v2848_v40 = vmax.f32 %v317_v7, 0.0  ;;  %v2526_v19 = vld [vmem:[#allocation2 + $0x1e8] sm:$0xff]  ;;  %v2465_v22 = vld [vmem:[#allocation2] sm:$0xff] }
 0x242   :  { %v680_v41 = vmul.f32 %v668_v28, %v2797_v30  ;;  %v683_v42 = vmul.f32 %v675_v29, %v479_v25  ;;  %v2852_v44 = vadd.f32 0.6, %v2762_v5  ;;  %v695_v48 = vmul.f32 2.5, %v2846_v36  ;;  %2054 = vmatpush.bf16.msrb.mxu2 %v2526_v19  ;;  %1926 = vmatpush.bf16.msrb.mxu3 %v2465_v22 }
 0x243   :  { %v1203_v46 = vpack.c.bf16 %v1055_v33, %v1055_v33  ;;  %v1204_v6 = vpack.c.bf16 %v1056_v34, %v1056_v34  ;;  %v684_v47 = vmul.f32 %v676_v35, %v2841_v27  ;;  %v899_v30 = vmul.f32 1.25, %v2760_v4  ;;  %v2525_v35 = vld [vmem:[#allocation2 + $0x1e0] sm:$0xff] }
 0x244   :  { %v2856_v52 = vadd.f32 %v683_v42, %v679_v31  ;;  %v696_v57 = vmul.f32 2.5, %v2852_v44  ;;  %v900_v58 = vmul.f32 1.25, %v2800_v32  ;;  %v903_v2 = vmul.f32 1.25, %v671_v15 }
 0x245   :  { %v1251_v0 = vunpack.c.l.b16 %v1203_v46  ;;  %v1252_v56 = vunpack.c.l.b16 %v1204_v6  ;;  %v688_v1 = vadd.f32 %v684_v47, %v680_v41  ;;  %v707_v3 = vmul.f32 %v695_v48, %v479_v25 }
 0x246   :  { %v904_v7 = vmul.f32 1.25, %v672_v26  ;;  %v907_v9 = vmul.f32 %v899_v30, %v2809_v53  ;;  %v908_v10 = vmul.f32 %v900_v58, %v2814_v62  ;;  %v911_v16 = vmul.f32 %v903_v2, %v2856_v52  ;;  %2055 = vmatpush.bf16.msrb.mxu2 %v2525_v35 }
 0x247   :  { %v1255_v14 = vpack.c.b16 %v1252_v56, %v1251_v0  ;;  %v1059_v17 = vmul.f32 0.8333333, %v2751_v61  ;;  %v1060_v18 = vmul.f32 0.8333333, %v2787_v20  ;;  %v1063_v23 = vmul.f32 0.8333333, %v671_v15 }
 0x248   :  { %v912_v12 = vmul.f32 %v904_v7, %v688_v1  ;;  %v1064_v24 = vmul.f32 0.8333333, %v672_v26  ;;  %vm483_vm5 = vcmp.ge.f32.partialorder %v2733_v54, -0.2  ;;  %v915_v53 = vadd.f32 %v911_v16, %v907_v9 }
 0x249   :  { %1946 = vmatmul.bf16.vlgmr.msrb.gmra.mxu0 %v1255_v14  ;;  %v1067_v62 = vmul.f32 %v1059_v17, %v2825_v21  ;;  %v1068_v25 = vmul.f32 %v1060_v18, %v2827_v49  ;;  %vm484_vm6 = vcmp.ge.f32.partialorder %v2762_v5, -0.2  ;;  %vm487_vm7 = vcmp.lt.f32.partialorder %v2733_v54, 0.2  ;;  %v2509_v21 = vld [vmem:[#allocation2 + $0x160] sm:$0xff]  ;;  %v2504_v18 = vld [vmem:[#allocation2 + $0x138] sm:$0xff] }
 0x24a   :  { %v916_v61 = vadd.f32 %v912_v12, %v908_v10  ;;  %vm488_vm8 = vcmp.lt.f32.partialorder %v2762_v5, 0.2  ;;  %v699_v20 = vsub.f32 0.2, %v2733_v54  ;;  %v708_v15 = vmul.f32 %v696_v57, %v2841_v27  ;;  %vm491_vm9 = vmand %vm483_vm5, %vm487_vm7  ;;  %v2517_v49 = vld [vmem:[#allocation2 + $0x1a0] sm:$0xff]  ;;  %2017 = vmatpush.bf16.msra.mxu0 %v2509_v21  ;;  %1995 = vmatpush.bf16.msra.mxu3 %v2504_v18 }
 0x24b   :  { %v1071_v26 = vmul.f32 %v1063_v23, %v915_v53  ;;  %v700_v28 = vsub.f32 0.2, %v2762_v5  ;;  %v919_v29 = vmul.f32 1.25, %v2768_v8  ;;  %vm492_vm10 = vmand %vm484_vm6, %vm488_vm8  ;;  %v2879_v33 = vsel %vm491_vm9, 1.0, %v3539_v43  ;;  %2036 = vmatpush.bf16.msra.mxu1 %v2517_v49 }
 0x24c   :  { %v1072_v31 = vmul.f32 %v1064_v24, %v916_v61  ;;  %v703_v34 = vmul.f32 2.5, %v699_v20  ;;  %v920_v27 = vmul.f32 1.25, %v2832_v55  ;;  %v2883_v38 = vsel %vm492_vm10, 1.0, %v3539_v43 }
 0x24d   :  { %v1075_v37 = vadd.f32 %v1071_v26, %v1067_v62  ;;  %v704_v39 = vmul.f32 2.5, %v700_v28  ;;  %v923_v41 = vmul.f32 1.25, %v699_v20  ;;  %v924_v46 = vmul.f32 1.25, %v700_v28 }
 0x24e   :  { %v1076_v42 = vadd.f32 %v1072_v31, %v1068_v25  ;;  %v711_v45 = vmul.f32 %v703_v34, %v2879_v33  ;;  %v927_v6 = vmul.f32 %v919_v29, %v2856_v52  ;;  %v928_v50 = vmul.f32 %v920_v27, %v688_v1 }
 0x24f   :  { %v1207_v47 = vpack.c.bf16 %v1075_v37, %v1075_v37  ;;  %v712_v48 = vmul.f32 %v704_v39, %v2883_v38  ;;  %v1079_v51 = vmul.f32 0.8333333, %v2760_v4  ;;  %v1080_v58 = vmul.f32 0.8333333, %v2800_v32 }
 0x250   :  { %v1208_v57 = vpack.c.bf16 %v1076_v42, %v1076_v42  ;;  %v2889_v30 = vadd.f32 %v711_v45, %v707_v3  ;;  %v1083_v59 = vmul.f32 0.8333333, %v699_v20  ;;  %v1084_v56 = vmul.f32 0.8333333, %v700_v28 }
 0x251   :  { %v1263_v63 = vunpack.c.l.b16 %v1207_v47  ;;  %v2892_v0 = vadd.f32 %v712_v48, %v708_v15  ;;  %v1087_v52 = vmul.f32 %v1079_v51, %v915_v53  ;;  %v2133_v1 = vmul.f32 -1.442695, %v2733_v54 }
 0x252   :  { %v1264_v2 = vunpack.c.l.b16 %v1208_v57  ;;  %v931_v7 = vmul.f32 %v923_v41, %v2889_v30  ;;  %v2134_v4 = vmul.f32 -1.442695, %v2762_v5  ;;  %vm405_vm11 = vcmp.ge.f32.partialorder %v2812_v60, -2.2 }
 0x253   :  { %v932_v9 = vmul.f32 %v924_v46, %v2892_v0  ;;  %vm406_vm12 = vcmp.ge.f32.partialorder %v2848_v40, -2.2  ;;  %vm409_vm13 = vcmp.lt.f32.partialorder %v2812_v60, -1.8  ;;  %2570 = vpow2.f32 %v2133_v1 }
 0x254   :  { %v1267_v32 = vpack.c.b16 %v1264_v2, %v1263_v63  ;;  %v2901_v3 = vadd.f32 %v931_v7, %v927_v6  ;;  %vm410_vm14 = vcmp.lt.f32.partialorder %v2848_v40, -1.8  ;;  %v1088_v11 = vmul.f32 %v1080_v58, %v916_v61  ;;  %vm2906_vm15 = vmand %vm405_vm11, %vm409_vm13 }
 0x255   :  { %v2904_v10 = vadd.f32 %v932_v9, %v928_v50  ;;  %2572 = vpow2.f32 %v2134_v4  ;;  %vm421_vm0 = vcmp.ge.f32.partialorder %v2812_v60, -1.8  ;;  %vm2912_vm1 = vmand %vm406_vm12, %vm410_vm14  ;;  %vm422_vm2 = vcmp.ge.f32.partialorder %v2848_v40, -1.8 }
 0x256   :  { %1965 = vmatmul.bf16.vlgmr.msrb.gmra.mxu1 %v1267_v32  ;;  %v1091_v14 = vmul.f32 %v1083_v59, %v2901_v3  ;;  %vm425_vm3 = vcmp.lt.f32.partialorder %v2812_v60, -1.4  ;;  %vm426_vm4 = vcmp.lt.f32.partialorder %v2848_v40, -1.4  ;;  %vm437_vm6 = vcmp.ge.f32.partialorder %v2812_v60, -1.4 }
 0x257   :  { %v1092_v17 = vmul.f32 %v1084_v56, %v2904_v10  ;;  %vm2920_vm5 = vmand %vm421_vm0, %vm425_vm3  ;;  %vm441_vm7 = vcmp.lt.f32.partialorder %v2812_v60, -1.0  ;;  %vm438_vm9 = vcmp.ge.f32.partialorder %v2848_v40, -1.4  ;;  %vm442_vm10 = vcmp.lt.f32.partialorder %v2848_v40, -1.0 }
 0x258   :  { %v1095_v22 = vadd.f32 %v1091_v14, %v1087_v52  ;;  %vm2926_vm8 = vmand %vm422_vm2, %vm426_vm4  ;;  %v417_v24 = vsel %vm2906_vm15, 1.0, %v3539_v43  ;;  %vm453_vm12 = vcmp.ge.f32.partialorder %v2812_v60, -1.0  ;;  %vm454_vm14 = vcmp.ge.f32.partialorder %v2848_v40, -1.0 }
 0x259   :  { %v1096_v23 = vadd.f32 %v1092_v17, %v1088_v11  ;;  %vm2935_vm11 = vmand %vm437_vm6, %vm441_vm7  ;;  %v2571_v62 = vpop.eup %2570  ;;  %vm457_vm0 = vcmp.lt.f32.partialorder %v2812_v60, -0.6  ;;  %vm458_vm2 = vcmp.lt.f32.partialorder %v2848_v40, -0.6  ;;  %v418_v28 = vsel %vm2912_vm1, 1.0, %v3539_v43 }
 0x25a   :  { %v1211_v25 = vpack.c.bf16 %v1095_v22, %v1095_v22  ;;  %vm2940_vm13 = vmand %vm438_vm9, %vm442_vm10  ;;  %v2947_v26 = vadd.f32 1.0, %v2571_v62  ;;  %v433_v29 = vsel %vm2920_vm5, 1.0, %v3539_v43  ;;  %v434_v49 = vsel %vm2926_vm8, 1.0, %v3539_v43 }
 0x25b   :  { %v2573_v20 = vpop.eup %2572  ;;  %v1212_v15 = vpack.c.bf16 %v1096_v23, %v1096_v23  ;;  %vm461_vm15 = vmand %vm453_vm12, %vm457_vm0  ;;  %v2961_v31 = vadd.f32 2.2, %v2812_v60  ;;  %v2964_v34 = vadd.f32 2.2, %v2848_v40  ;;  %v2970_v37 = vsel %vm2935_vm11, 1.0, %v3539_v43 }
 0x25c   :  { %v2955_v21 = vadd.f32 1.0, %v2573_v20  ;;  %v1275_v27 = vunpack.c.l.b16 %v1211_v25  ;;  %2574 = vrcp.f32 %v2947_v26  ;;  %vm462_vm1 = vmand %vm454_vm14, %vm458_vm2  ;;  %v350_v39 = vand.u32 2147483648, %v2947_v26 }
 0x25d   :  { %v1276_v35 = vunpack.c.l.b16 %v1212_v15  ;;  %v2981_v41 = vsel %vm2940_vm13, 1.0, %v3539_v43  ;;  %v2984_v42 = vsel %vm461_vm15, 1.0, %v3539_v43  ;;  %v348_v46 = vand.u32 2147483647, %v2947_v26 }
 0x25e   :  { %2576 = vrcp.f32 %v2955_v21  ;;  %v363_v6 = vand.u32 2147483647, %v2955_v21  ;;  %v365_v47 = vand.u32 2147483648, %v2955_v21  ;;  %v351_v48 = vor.u32 1.1754944e-38, %v350_v39 }
 0x25f   :  { %v1279_v45 = vpack.c.b16 %v1276_v35, %v1275_v27  ;;  %v2990_v50 = vsel %vm462_vm1, 1.0, %v3539_v43  ;;  %v585_v51 = vmul.f32 2.5, %v2961_v31  ;;  %v586_v57 = vmul.f32 2.5, %v2964_v34 }
 0x260   :  { %v366_v58 = vor.u32 1.1754944e-38, %v365_v47  ;;  %v589_v59 = vsub.f32 -1.4, %v2812_v60  ;;  %v590_v63 = vsub.f32 -1.4, %v2848_v40  ;;  %v617_v56 = vsub.f32 -1.0, %v2812_v60 }
 0x261   :  { %1984 = vmatmul.bf16.vlgmr.msra.gmra.mxu2 %v1279_v45  ;;  %vm344_vm3 = vweird.f32 %v2947_v26  ;;  %v597_v52 = vmul.f32 %v585_v51, %v417_v24  ;;  %v598_v2 = vmul.f32 %v586_v57, %v418_v28  ;;  %v2999_v7 = vadd.f32 1.8, %v2812_v60 }
 0x262   :  { %v3002_v1 = vadd.f32 1.8, %v2848_v40  ;;  %v2575_v4 = vpop.eup %2574  ;;  %vm359_vm4 = vweird.f32 %v2955_v21  ;;  %v593_v9 = vmul.f32 2.5, %v589_v59  ;;  %v594_v32 = vmul.f32 2.5, %v590_v63 }
 0x263   :  { %v618_v11 = vsub.f32 -1.0, %v2848_v40  ;;  %v621_v13 = vmul.f32 2.5, %v617_v56  ;;  %v340_v16 = vmul.f32 %v2575_v4, %v2947_v26  ;;  %vm345_vm5 = vweird.f32 %v2575_v4 }
 0x264   :  { %v2577_v14 = vpop.eup %2576  ;;  %vm3007_vm6 = vcmp.eq.f32.partialorder %v348_v46, 8.507059e+37  ;;  %v613_v18 = vmul.f32 2.5, %v2999_v7  ;;  %v614_v19 = vmul.f32 2.5, %v3002_v1  ;;  %vm3014_vm8 = vcmp.eq.f32.partialorder %v363_v6, 8.507059e+37  ;;  %vm346_vm9 = vmor %vm344_vm3, %vm345_vm5 }
 0x265   :  { %v355_v22 = vmul.f32 %v2577_v14, %v2955_v21  ;;  %vm360_vm7 = vweird.f32 %v2577_v14  ;;  %v601_v23 = vmul.f32 %v593_v9, %v433_v29  ;;  %v602_v24 = vmul.f32 %v594_v32, %v434_v49 }
 0x266   :  { %v341_v53 = vsub.f32 1.0, %v340_v16  ;;  %v622_v62 = vmul.f32 2.5, %v618_v11  ;;  %v625_v25 = vmul.f32 %v613_v18, %v433_v29  ;;  %v626_v61 = vmul.f32 %v614_v19, %v434_v49  ;;  %vm361_vm10 = vmor %vm359_vm4, %vm360_vm7 }
 0x267   :  { %v356_v20 = vsub.f32 1.0, %v355_v22  ;;  %v605_v15 = vadd.f32 %v601_v23, %v597_v52  ;;  %v606_v28 = vadd.f32 %v602_v24, %v598_v2  ;;  %v629_v27 = vmul.f32 %v621_v13, %v2970_v37 }
 0x268   :  { %v342_v35 = vmul.f32 %v2575_v4, %v341_v53  ;;  %v630_v39 = vmul.f32 %v622_v62, %v2981_v41  ;;  %v3021_v45 = vadd.f32 1.4, %v2812_v60  ;;  %v3024_v46 = vadd.f32 1.4, %v2848_v40 }
 0x269   :  { %v357_v6 = vmul.f32 %v2577_v14, %v356_v20  ;;  %v633_v47 = vadd.f32 %v629_v27, %v625_v25  ;;  %v645_v51 = vsub.f32 -0.6, %v2812_v60  ;;  %v646_v29 = vsub.f32 -0.6, %v2848_v40 }
 0x26a   :  { %v343_v49 = vadd.f32 %v2575_v4, %v342_v35  ;;  %v634_v57 = vadd.f32 %v630_v39, %v626_v61  ;;  %v641_v59 = vmul.f32 2.5, %v3021_v45  ;;  %v642_v63 = vmul.f32 2.5, %v3024_v46 }
 0x26b   :  { %v358_v52 = vadd.f32 %v2577_v14, %v357_v6  ;;  %v649_v2 = vmul.f32 2.5, %v645_v51  ;;  %v650_v9 = vmul.f32 2.5, %v646_v29  ;;  %v861_v32 = vmul.f32 1.25, %v2961_v31 }
 0x26c   :  { %v347_v13 = vsel %vm346_vm9, %v2575_v4, %v343_v49  ;;  %v653_v16 = vmul.f32 %v641_v59, %v2970_v37  ;;  %v654_v18 = vmul.f32 %v642_v63, %v2981_v41  ;;  %v862_v19 = vmul.f32 1.25, %v2964_v34 }
 0x26d   :  { %v352_v26 = vsel %vm3007_vm6, %v351_v48, %v347_v13  ;;  %v362_v22 = vsel %vm361_vm10, %v2577_v14, %v358_v52  ;;  %v657_v23 = vmul.f32 %v649_v2, %v2984_v42  ;;  %v658_v24 = vmul.f32 %v650_v9, %v2990_v50 }
 0x26e   :  { %v367_v4 = vsel %vm3014_vm8, %v366_v58, %v362_v22  ;;  %v399_v21 = vmul.f32 %v352_v26, %v2733_v54  ;;  %v865_v53 = vmul.f32 1.25, %v617_v56  ;;  %v866_v62 = vmul.f32 1.25, %v618_v11 }
 0x26f   :  { %v400_v37 = vmul.f32 %v367_v4, %v2762_v5  ;;  %v3048_v41 = vadd.f32 %v657_v23, %v653_v16  ;;  %v3050_v25 = vadd.f32 %v658_v24, %v654_v18  ;;  %v869_v17 = vmul.f32 %v861_v32, %v605_v15 }
 0x270   :  { %v1199_v48 = vpack.c.bf16 %v399_v21, %v399_v21  ;;  %v870_v14 = vmul.f32 %v862_v19, %v606_v28  ;;  %v873_v61 = vmul.f32 %v865_v53, %v633_v47  ;;  %v874_v20 = vmul.f32 %v866_v62, %v634_v57  ;;  %v2508_v21 = vld [vmem:[#allocation2 + $0x158] sm:$0xff] }
 0x271   :  { %v1200_v27 = vpack.c.bf16 %v400_v37, %v400_v37  ;;  %v881_v35 = vmul.f32 1.25, %v2999_v7  ;;  %v882_v58 = vmul.f32 1.25, %v3002_v1  ;;  %v885_v12 = vmul.f32 1.25, %v645_v51  ;;  %v2516_v53 = vld [vmem:[#allocation2 + $0x198] sm:$0xff]  ;;  %2018 = vmatpush.bf16.msra.mxu0 %v2508_v21 }
 0x272   :  { %v1239_v39 = vunpack.c.l.b16 %v1199_v48  ;;  %v877_v56 = vadd.f32 %v873_v61, %v869_v17  ;;  %v878_v11 = vadd.f32 %v874_v20, %v870_v14  ;;  %v886_v6 = vmul.f32 1.25, %v646_v29  ;;  %v2524_v14 = vld [vmem:[#allocation2 + $0x1d8] sm:$0xff]  ;;  %v2503_v61 = vld [vmem:[#allocation2 + $0x130] sm:$0xff]  ;;  %2037 = vmatpush.bf16.msra.mxu1 %v2516_v53 }
 0x273   :  { %v1240_v49 = vunpack.c.l.b16 %v1200_v27  ;;  %v889_v59 = vmul.f32 %v881_v35, %v633_v47  ;;  %v890_v63 = vmul.f32 %v882_v58, %v634_v57  ;;  %v893_v52 = vmul.f32 %v885_v12, %v3048_v41  ;;  %v2507_v12 = vld [vmem:[#allocation2 + $0x150] sm:$0xff]  ;;  %2056 = vmatpush.bf16.msrb.mxu2 %v2524_v14  ;;  %1996 = vmatpush.bf16.msra.mxu3 %v2503_v61  ;;  %v2513_v14 = vld [vmem:[#allocation2 + $0x180] sm:$0xff] }
 0x274   :  { %v894_v15 = vmul.f32 %v886_v6, %v3050_v25  ;;  %v1041_v28 = vmul.f32 0.8333333, %v2961_v31  ;;  %v1042_v2 = vmul.f32 0.8333333, %v2964_v34  ;;  %v1045_v9 = vmul.f32 0.8333333, %v645_v51 }
 0x275   :  { %v1243_v32 = vpack.c.b16 %v1240_v49, %v1239_v39  ;;  %v3058_v13 = vadd.f32 %v893_v52, %v889_v59  ;;  %v1046_v16 = vmul.f32 0.8333333, %v646_v29  ;;  %vm469_vm11 = vcmp.ge.f32.partialorder %v2812_v60, -0.6  ;;  %v2515_v39 = vld [vmem:[#allocation2 + $0x190] sm:$0xff]  ;;  %2019 = vmatpush.bf16.msra.mxu0 %v2507_v12 }
 0x276   :  { %v3061_v18 = vadd.f32 %v894_v15, %v890_v63  ;;  %v1049_v19 = vmul.f32 %v1041_v28, %v877_v56  ;;  %v1050_v47 = vmul.f32 %v1042_v2, %v878_v11  ;;  %vm470_vm12 = vcmp.ge.f32.partialorder %v2848_v40, -0.6  ;;  %v2523_v59 = vld [vmem:[#allocation2 + $0x1d0] sm:$0xff]  ;;  %v2502_v63 = vld [vmem:[#allocation2 + $0x128] sm:$0xff]  ;;  %2038 = vmatpush.bf16.msra.mxu1 %v2515_v39 }
 0x277   :  { %1927 = vmatmul.bf16.vlgmr.msrb.gmra.mxu3 %v1243_v32  ;;  %v1053_v57 = vmul.f32 %v1045_v9, %v3058_v13  ;;  %vm473_vm13 = vcmp.lt.f32.partialorder %v2812_v60, -0.2  ;;  %vm474_vm14 = vcmp.lt.f32.partialorder %v2848_v40, -0.2  ;;  %v3068_v31 = vadd.f32 1.0, %v2812_v60  ;;  %2057 = vmatpush.bf16.msrb.mxu2 %v2523_v59 }
 0x278   :  { %v1054_v34 = vmul.f32 %v1046_v16, %v3061_v18  ;;  %vm477_vm0 = vmand %vm469_vm11, %vm473_vm13  ;;  %v3072_v51 = vadd.f32 1.0, %v2848_v40  ;;  %v673_v29 = vsub.f32 -0.2, %v2812_v60  ;;  %v674_v26 = vsub.f32 -0.2, %v2848_v40  ;;  %1997 = vmatpush.bf16.msra.mxu3 %v2502_v63 }
 0x279   :  { %v1057_v22 = vadd.f32 %v1053_v57, %v1049_v19  ;;  %vm478_vm2 = vmand %vm470_vm12, %vm474_vm14  ;;  %v3077_v23 = vsel %vm477_vm0, 1.0, %v3539_v43  ;;  %v669_v24 = vmul.f32 2.5, %v3068_v31  ;;  %v901_v4 = vmul.f32 1.25, %v3021_v45  ;;  %v2514_v19 = vld [vmem:[#allocation2 + $0x188] sm:$0xff] }
 0x27a   :  { %v1058_v62 = vadd.f32 %v1054_v34, %v1050_v47  ;;  %v3082_v37 = vsel %vm478_vm2, 1.0, %v3539_v43  ;;  %v670_v17 = vmul.f32 2.5, %v3072_v51  ;;  %v677_v48 = vmul.f32 2.5, %v673_v29  ;;  %2039 = vmatpush.bf16.msra.mxu1 %v2514_v19 }
 0x27b   :  { %v1205_v20 = vpack.c.bf16 %v1057_v22, %v1057_v22  ;;  %v678_v27 = vmul.f32 2.5, %v674_v26  ;;  %v681_v35 = vmul.f32 %v669_v24, %v2984_v42  ;;  %v902_v58 = vmul.f32 1.25, %v3024_v46 }
 0x27c   :  { %v1206_v56 = vpack.c.bf16 %v1058_v62, %v1058_v62  ;;  %v682_v11 = vmul.f32 %v670_v17, %v2990_v50  ;;  %v685_v6 = vmul.f32 %v677_v48, %v3077_v23  ;;  %v905_v49 = vmul.f32 1.25, %v673_v29  ;;  %v2506_v50 = vld [vmem:[#allocation2 + $0x148] sm:$0xff] }
 0x27d   :  { %v1253_v52 = vunpack.c.l.b16 %v1205_v20  ;;  %v686_v15 = vmul.f32 %v678_v27, %v3082_v37  ;;  %v906_v42 = vmul.f32 1.25, %v674_v26  ;;  %v909_v28 = vmul.f32 %v901_v4, %v3048_v41  ;;  %v2522_v41 = vld [vmem:[#allocation2 + $0x1c8] sm:$0xff]  ;;  %2020 = vmatpush.bf16.msra.mxu0 %v2506_v50 }
 0x27e   :  { %v1254_v2 = vunpack.c.l.b16 %v1206_v56  ;;  %v689_v9 = vadd.f32 %v685_v6, %v681_v35  ;;  %v910_v32 = vmul.f32 %v902_v58, %v3050_v25  ;;  %v1061_v16 = vmul.f32 0.8333333, %v2999_v7  ;;  %v2501_v25 = vld [vmem:[#allocation2 + $0x120] sm:$0xff]  ;;  %2058 = vmatpush.bf16.msrb.mxu2 %v2522_v41  ;;  %2040 = vmatpush.bf16.msra.mxu1 %v2513_v14 }
 0x27f   :  { %v690_v47 = vadd.f32 %v686_v15, %v682_v11  ;;  %v1062_v57 = vmul.f32 0.8333333, %v3002_v1  ;;  %v1065_v34 = vmul.f32 0.8333333, %v673_v29  ;;  %v1066_v22 = vmul.f32 0.8333333, %v674_v26  ;;  %1998 = vmatpush.bf16.msra.mxu3 %v2501_v25 }
 0x280   :  { %v1256_v24 = vpack.c.b16 %v1254_v2, %v1253_v52  ;;  %v913_v21 = vmul.f32 %v905_v49, %v689_v9  ;;  %v1069_v53 = vmul.f32 %v1061_v16, %v3058_v13  ;;  %vm485_vm15 = vcmp.ge.f32.partialorder %v2812_v60, -0.2  ;;  %v2505_v1 = vld [vmem:[#allocation2 + $0x140] sm:$0xff] }
 0x281   :  { %v914_v7 = vmul.f32 %v906_v42, %v690_v47  ;;  %v1070_v4 = vmul.f32 %v1062_v57, %v3061_v18  ;;  %vm486_vm1 = vcmp.ge.f32.partialorder %v2848_v40, -0.2  ;;  %vm489_vm3 = vcmp.lt.f32.partialorder %v2812_v60, 0.2  ;;  %v2521_v58 = vld [vmem:[#allocation2 + $0x1c0] sm:$0xff]  ;;  %2021 = vmatpush.bf16.msra.mxu0 %v2505_v1 }
 0x282   :  { %1951 = vmatmul.bf16.gmra.mxu0 %v1256_v24  ;;  %v917_v29 = vadd.f32 %v913_v21, %v909_v28  ;;  %vm490_vm4 = vcmp.lt.f32.partialorder %v2848_v40, 0.2  ;;  %vm493_vm5 = vmand %vm485_vm15, %vm489_vm3  ;;  %v3101_v13 = vadd.f32 0.6, %v2812_v60  ;;  %v3104_v26 = vadd.f32 0.6, %v2848_v40  ;;  %2059 = vmatpush.bf16.msrb.mxu2 %v2521_v58 }
 0x283   :  { %v918_v62 = vadd.f32 %v914_v7, %v910_v32  ;;  %vm494_vm6 = vmand %vm486_vm1, %vm490_vm4  ;;  %v3107_v18 = vsel %vm493_vm5, 1.0, %v3539_v43  ;;  %v701_v17 = vsub.f32 0.2, %v2812_v60  ;;  %v702_v48 = vsub.f32 0.2, %v2848_v40 }
 0x284   :  { %v1073_v61 = vmul.f32 %v1065_v34, %v917_v29  ;;  %v3112_v20 = vsel %vm494_vm6, 1.0, %v3539_v43  ;;  %v697_v27 = vmul.f32 2.5, %v3101_v13  ;;  %v698_v35 = vmul.f32 2.5, %v3104_v26 }
 0x285   :  { %v1074_v12 = vmul.f32 %v1066_v22, %v918_v62  ;;  %v705_v39 = vmul.f32 2.5, %v701_v17  ;;  %v706_v56 = vmul.f32 2.5, %v702_v48  ;;  %v921_v11 = vmul.f32 1.25, %v3068_v31 }
 0x286   :  { %v1077_v6 = vadd.f32 %v1073_v61, %v1069_v53  ;;  %v709_v49 = vmul.f32 %v697_v27, %v3077_v23  ;;  %v710_v59 = vmul.f32 %v698_v35, %v3082_v37  ;;  %v922_v63 = vmul.f32 1.25, %v3072_v51  ;;  %v2500_v35 = vld [vmem:[#allocation2 + $0x118] sm:$0xff] }
 0x287   :  { %v1078_v52 = vadd.f32 %v1074_v12, %v1070_v4  ;;  %v713_v15 = vmul.f32 %v705_v39, %v3107_v18  ;;  %v714_v42 = vmul.f32 %v706_v56, %v3112_v20  ;;  %v925_v28 = vmul.f32 1.25, %v701_v17  ;;  %1999 = vmatpush.bf16.msra.mxu3 %v2500_v35 }
 0x288   :  { %v1209_v2 = vpack.c.bf16 %v1077_v6, %v1077_v6  ;;  %v926_v32 = vmul.f32 1.25, %v702_v48  ;;  %v929_v16 = vmul.f32 %v921_v11, %v689_v9  ;;  %v930_v50 = vmul.f32 %v922_v63, %v690_v47 }
 0x289   :  { %v1210_v19 = vpack.c.bf16 %v1078_v52, %v1078_v52  ;;  %v3122_v57 = vadd.f32 %v713_v15, %v709_v49  ;;  %v3124_v23 = vadd.f32 %v714_v42, %v710_v59  ;;  %v1081_v37 = vmul.f32 0.8333333, %v3021_v45 }
 0x28a   :  { %v1265_v34 = vunpack.c.l.b16 %v1209_v2  ;;  %v1082_v22 = vmul.f32 0.8333333, %v3024_v46  ;;  %v1085_v24 = vmul.f32 0.8333333, %v701_v17  ;;  %v1086_v21 = vmul.f32 0.8333333, %v702_v48 }
 0x28b   :  { %v1266_v53 = vunpack.c.l.b16 %v1210_v19  ;;  %v933_v41 = vmul.f32 %v925_v28, %v3122_v57  ;;  %v934_v25 = vmul.f32 %v926_v32, %v3124_v23  ;;  %v1089_v9 = vmul.f32 %v1081_v37, %v917_v29 }
 0x28c   :  { %v1090_v47 = vmul.f32 %v1082_v22, %v918_v62  ;;  %v2135_v7 = vmul.f32 -1.442695, %v2812_v60  ;;  %v2136_v4 = vmul.f32 -1.442695, %v2848_v40  ;;  %vm499_vm7 = vcmp.ge.f32.partialorder %v2733_v54, 0.2 }
 0x28d   :  { %v1268_v1 = vpack.c.b16 %v1266_v53, %v1265_v34  ;;  %v3133_v45 = vadd.f32 %v933_v41, %v929_v16  ;;  %v3135_v14 = vadd.f32 %v934_v25, %v930_v50  ;;  %vm500_vm8 = vcmp.ge.f32.partialorder %v2762_v5, 0.2 }
 0x28e   :  { %2578 = vpow2.f32 %v2135_v7  ;;  %vm503_vm9 = vcmp.lt.f32.partialorder %v2733_v54, 0.6  ;;  %vm504_vm10 = vcmp.lt.f32.partialorder %v2762_v5, 0.6  ;;  %vm515_vm12 = vcmp.ge.f32.partialorder %v2733_v54, 0.6 }
 0x28f   :  { %1970 = vmatmul.bf16.gmra.mxu1 %v1268_v1  ;;  %v1093_v46 = vmul.f32 %v1085_v24, %v3133_v45  ;;  %v1094_v29 = vmul.f32 %v1086_v21, %v3135_v14  ;;  %2580 = vpow2.f32 %v2136_v4  ;;  %vm507_vm11 = vmand %vm499_vm7, %vm503_vm9  ;;  %vm516_vm14 = vcmp.ge.f32.partialorder %v2762_v5, 0.6 }
 0x290   :  { %vm3143_vm13 = vmand %vm500_vm8, %vm504_vm10  ;;  %v511_v17 = vsel %vm507_vm11, 1.0, %v3539_v43  ;;  %v3150_v48 = vadd.f32 0.2, %v2733_v54  ;;  %vm519_vm0 = vcmp.lt.f32.partialorder %v2733_v54, 1.0  ;;  %v3154_v58 = vadd.f32 0.2, %v2762_v5 }
 0x291   :  { %v1097_v61 = vadd.f32 %v1093_v46, %v1089_v9  ;;  %v1098_v27 = vadd.f32 %v1094_v29, %v1090_v47  ;;  %vm520_vm2 = vcmp.lt.f32.partialorder %v2762_v5, 1.0  ;;  %v3159_v39 = vsub.f32 0.6, %v2733_v54  ;;  %vm3170_vm15 = vmand %vm515_vm12, %vm519_vm0 }
 0x292   :  { %v723_v12 = vmul.f32 2.5, %v3150_v48  ;;  %v3162_v56 = vsub.f32 0.6, %v2762_v5  ;;  %v512_v49 = vsel %vm3143_vm13, 1.0, %v3539_v43  ;;  %v724_v59 = vmul.f32 2.5, %v3154_v58  ;;  %vm524_vm1 = vmand %vm516_vm14, %vm520_vm2 }
 0x293   :  { %v1213_v11 = vpack.c.bf16 %v1097_v61, %v1097_v61  ;;  %v1214_v6 = vpack.c.bf16 %v1098_v27, %v1098_v27  ;;  %v731_v15 = vmul.f32 2.5, %v3159_v39  ;;  %v3178_v2 = vadd.f32 -0.2, %v2733_v54 }
 0x294   :  { %v2579_v63 = vpop.eup %2578  ;;  %v732_v42 = vmul.f32 2.5, %v3162_v56  ;;  %v735_v28 = vmul.f32 %v723_v12, %v2879_v33  ;;  %v736_v37 = vmul.f32 %v724_v59, %v2883_v38  ;;  %v3190_v33 = vadd.f32 -0.2, %v2762_v5 }
 0x295   :  { %v2581_v32 = vpop.eup %2580  ;;  %v1277_v16 = vunpack.c.l.b16 %v1213_v11  ;;  %v1278_v50 = vunpack.c.l.b16 %v1214_v6  ;;  %v3180_v19 = vadd.f32 1.0, %v2579_v63  ;;  %v739_v22 = vmul.f32 %v731_v15, %v511_v17 }
 0x296   :  { %v3187_v34 = vadd.f32 1.0, %v2581_v32  ;;  %v740_v24 = vmul.f32 %v732_v42, %v512_v49  ;;  %v3198_v41 = vsel %vm3170_vm15, 1.0, %v3539_v43  ;;  %v3201_v38 = vsel %vm524_vm1, 1.0, %v3539_v43 }
 0x297   :  { %v1280_v21 = vpack.c.b16 %v1278_v50, %v1277_v16  ;;  %2582 = vrcp.f32 %v3180_v19  ;;  %v380_v53 = vand.u32 2147483648, %v3180_v19  ;;  %v378_v25 = vand.u32 2147483647, %v3180_v19 }
 0x298   :  { %2584 = vrcp.f32 %v3187_v34  ;;  %v393_v9 = vand.u32 2147483647, %v3187_v34  ;;  %v395_v47 = vand.u32 2147483648, %v3187_v34  ;;  %v743_v7 = vadd.f32 %v739_v22, %v735_v28 }
 0x299   :  { %1989 = vmatmul.bf16.gmra.mxu2 %v1280_v21  ;;  %v381_v4 = vor.u32 1.1754944e-38, %v380_v53  ;;  %v744_v1 = vadd.f32 %v740_v24, %v736_v37  ;;  %v751_v46 = vmul.f32 2.5, %v3178_v2  ;;  %v752_v29 = vmul.f32 2.5, %v3190_v33 }
 0x29a   :  { %v396_v62 = vor.u32 1.1754944e-38, %v395_v47  ;;  %v755_v61 = vsub.f32 1.0, %v2733_v54  ;;  %v756_v27 = vsub.f32 1.0, %v2762_v5  ;;  %v939_v35 = vmul.f32 1.25, %v2846_v36 }
 0x29b   :  { %vm374_vm3 = vweird.f32 %v3180_v19  ;;  %v763_v12 = vmul.f32 %v751_v46, %v511_v17  ;;  %v764_v11 = vmul.f32 %v752_v29, %v512_v49  ;;  %v940_v6 = vmul.f32 1.25, %v2852_v44 }
 0x29c   :  { %v943_v59 = vmul.f32 1.25, %v3159_v39  ;;  %vm389_vm4 = vweird.f32 %v3187_v34  ;;  %v759_v52 = vmul.f32 2.5, %v755_v61  ;;  %v760_v15 = vmul.f32 2.5, %v756_v27 }
 0x29d   :  { %v2583_v63 = vpop.eup %2582  ;;  %v944_v42 = vmul.f32 1.25, %v3162_v56  ;;  %v947_v28 = vmul.f32 %v939_v35, %v2889_v30  ;;  %vm3218_vm6 = vcmp.eq.f32.partialorder %v378_v25, 8.507059e+37  ;;  %v948_v49 = vmul.f32 %v940_v6, %v2892_v0 }
 0x29e   :  { %v2585_v32 = vpop.eup %2584  ;;  %v370_v16 = vmul.f32 %v2583_v63, %v3180_v19  ;;  %vm375_vm5 = vweird.f32 %v2583_v63  ;;  %v951_v50 = vmul.f32 %v943_v59, %v743_v7  ;;  %vm3224_vm8 = vcmp.eq.f32.partialorder %v393_v9, 8.507059e+37 }
 0x29f   :  { %v385_v37 = vmul.f32 %v2585_v32, %v3187_v34  ;;  %vm390_vm7 = vweird.f32 %v2585_v32  ;;  %v767_v30 = vmul.f32 %v759_v52, %v3198_v41  ;;  %v768_v24 = vmul.f32 %v760_v15, %v3201_v38  ;;  %vm376_vm9 = vmor %vm374_vm3, %vm375_vm5 }
 0x2a0   :  { %v371_v21 = vsub.f32 1.0, %v370_v16  ;;  %v952_v53 = vmul.f32 %v944_v42, %v744_v1  ;;  %v3230_v25 = vadd.f32 %v951_v50, %v947_v28  ;;  %v959_v47 = vmul.f32 1.25, %v3150_v48  ;;  %vm391_vm10 = vmor %vm389_vm4, %vm390_vm7 }
 0x2a1   :  { %v386_v46 = vsub.f32 1.0, %v385_v37  ;;  %v3233_v0 = vadd.f32 %v767_v30, %v763_v12  ;;  %v3235_v29 = vadd.f32 %v768_v24, %v764_v11  ;;  %v960_v9 = vmul.f32 1.25, %v3154_v58 }
 0x2a2   :  { %v372_v35 = vmul.f32 %v2583_v63, %v371_v21  ;;  %v3238_v6 = vadd.f32 %v952_v53, %v948_v49  ;;  %v963_v59 = vmul.f32 1.25, %v755_v61  ;;  %v964_v52 = vmul.f32 1.25, %v756_v27 }
 0x2a3   :  { %v387_v43 = vmul.f32 %v2585_v32, %v386_v46  ;;  %v967_v15 = vmul.f32 %v959_v47, %v743_v7  ;;  %v968_v16 = vmul.f32 %v960_v9, %v744_v1  ;;  %v1119_v42 = vmul.f32 0.8333333, %v2846_v36 }
 0x2a4   :  { %v373_v28 = vadd.f32 %v2583_v63, %v372_v35  ;;  %v971_v50 = vmul.f32 %v963_v59, %v3233_v0  ;;  %v972_v12 = vmul.f32 %v964_v52, %v3235_v29  ;;  %v1120_v11 = vmul.f32 0.8333333, %v2852_v44 }
 0x2a5   :  { %v388_v49 = vadd.f32 %v2585_v32, %v387_v43  ;;  %v1123_v37 = vmul.f32 0.8333333, %v755_v61  ;;  %v1124_v30 = vmul.f32 0.8333333, %v756_v27  ;;  %v1127_v24 = vmul.f32 %v1119_v42, %v3230_v25  ;;  %v2536_v42 = vld [vmem:[#allocation2 + $0x238] sm:$0xff] }
 0x2a6   :  { %v377_v7 = vsel %vm376_vm9, %v2583_v63, %v373_v28  ;;  %v3251_v36 = vadd.f32 %v971_v50, %v967_v15  ;;  %v3253_v1 = vadd.f32 %v972_v12, %v968_v16  ;;  %v1128_v44 = vmul.f32 %v1120_v11, %v3238_v6  ;;  %v2499_v28 = vld [vmem:[#allocation2 + $0x110] sm:$0xff]  ;;  %2071 = vmatpush.bf16.msrb.mxu0 %v2536_v42 }
 0x2a7   :  { %v382_v19 = vsel %vm3218_vm6, %v381_v4, %v377_v7  ;;  %v392_v21 = vsel %vm391_vm10, %v2585_v32, %v388_v49  ;;  %vm531_vm11 = vcmp.ge.f32.partialorder %v2733_v54, 1.0  ;;  %vm532_vm12 = vcmp.ge.f32.partialorder %v2762_v5, 1.0  ;;  %2000 = vmatpush.bf16.msra.mxu3 %v2499_v28 }
 0x2a8   :  { %v397_v43 = vsel %vm3224_vm8, %v396_v62, %v392_v21  ;;  %v401_v34 = vmul.f32 %v382_v19, %v2812_v60  ;;  %v1131_v61 = vmul.f32 %v1123_v37, %v3251_v36  ;;  %v1132_v27 = vmul.f32 %v1124_v30, %v3253_v1 }
 0x2a9   :  { %v402_v63 = vmul.f32 %v397_v43, %v2848_v40  ;;  %vm535_vm13 = vcmp.lt.f32.partialorder %v2733_v54, 1.4  ;;  %vm536_vm14 = vcmp.lt.f32.partialorder %v2762_v5, 1.4  ;;  %v3269_v4 = vadd.f32 -0.6, %v2733_v54 }
 0x2aa   :  { %v1201_v32 = vpack.c.bf16 %v401_v34, %v401_v34  ;;  %v1135_v17 = vadd.f32 %v1131_v61, %v1127_v24  ;;  %v1136_v53 = vadd.f32 %v1132_v27, %v1128_v44  ;;  %vm539_vm0 = vmand %vm531_vm11, %vm535_vm13  ;;  %v3272_v62 = vadd.f32 -0.6, %v2762_v5  ;;  %v2498_v44 = vld [vmem:[#allocation2 + $0x108] sm:$0xff]  ;;  %v3290_v61 = vld [vmem:[#allocation2 + $0x230] sm:$0xff] }
 0x2ab   :  { %3567 = vst [vmem:[#allocation8_spill] sm:$0xff] %v3269_v4  ;;  %v1202_v22 = vpack.c.bf16 %v402_v63, %v402_v63  ;;  %vm540_vm2 = vmand %vm532_vm12, %vm536_vm14  ;;  %v3569_v47 = vmov 0.0   ;;  %v779_v9 = vmul.f32 2.5, %v3269_v4  ;;  %v783_v35 = vsub.f32 1.4, %v2733_v54  ;;  %2001 = vmatpush.bf16.msra.mxu3 %v2498_v44  ;;  %2072 = vmatpush.bf16.msrb.mxu0 %v3290_v61 }
 0x2ac   :  { %3568 = vst [vmem:[#allocation9_spill] sm:$0xff] %v3272_v62  ;;  %v3277_v46 = vsel %vm539_vm0, 1.0, %v3569_v47  ;;  %v1241_v59 = vunpack.c.l.b16 %v1201_v32  ;;  %v1219_v52 = vpack.c.bf16 %v1135_v17, %v1135_v17  ;;  %v1220_v15 = vpack.c.bf16 %v1136_v53, %v1136_v53 }
 0x2ad   :  { %v3282_v16 = vsel %vm540_vm2, 1.0, %v3569_v47  ;;  %v1242_v50 = vunpack.c.l.b16 %v1202_v22  ;;  %v780_v12 = vmul.f32 2.5, %v3272_v62  ;;  %v784_v11 = vsub.f32 1.4, %v2762_v5 }
 0x2ae   :  { %v787_v49 = vmul.f32 2.5, %v783_v35  ;;  %v1299_v37 = vunpack.c.l.b16 %v1219_v52  ;;  %v1300_v30 = vunpack.c.l.b16 %v1220_v15  ;;  %v791_v24 = vmul.f32 %v779_v9, %v3198_v41 }
 0x2af   :  { %v979_v7 = vmul.f32 1.25, %v3178_v2  ;;  %v1244_v19 = vpack.c.b16 %v1242_v50, %v1241_v59  ;;  %v788_v21 = vmul.f32 2.5, %v784_v11  ;;  %v792_v43 = vmul.f32 %v780_v12, %v3201_v38  ;;  %v2497_v59 = vld [vmem:[#allocation2 + $0x100] sm:$0xff] }
 0x2b0   :  { %v795_v34 = vmul.f32 %v787_v49, %v3277_v46  ;;  %v1303_v27 = vpack.c.b16 %v1300_v30, %v1299_v37  ;;  %v980_v63 = vmul.f32 1.25, %v3190_v33  ;;  %v983_v32 = vmul.f32 1.25, %v783_v35  ;;  %2002 = vmatpush.bf16.msra.mxu3 %v2497_v59 }
 0x2b1   :  { %v984_v17 = vmul.f32 1.25, %v784_v11  ;;  %1932 = vmatmul.bf16.gmra.mxu3 %v1244_v19  ;;  %v796_v41 = vmul.f32 %v788_v21, %v3282_v16  ;;  %v987_v22 = vmul.f32 %v979_v7, %v3233_v0  ;;  %v1139_v9 = vmul.f32 0.8333333, %v3150_v48  ;;  %v2534_v0 = vld [vmem:[#allocation2 + $0x228] sm:$0xff]  ;;  %v2533_v21 = vld [vmem:[#allocation2 + $0x220] sm:$0xff] }
 0x2b2   :  { %v799_v53 = vadd.f32 %v795_v34, %v791_v24  ;;  %2022 = vmatmul.bf16.vlgmr.msra.gmra.mxu0 %v1303_v27  ;;  %v988_v38 = vmul.f32 %v980_v63, %v3235_v29  ;;  %v1140_v52 = vmul.f32 0.8333333, %v3154_v58  ;;  %v1143_v15 = vmul.f32 0.8333333, %v783_v35 }
 0x2b3   :  { %v1144_v28 = vmul.f32 0.8333333, %v784_v11  ;;  %v800_v50 = vadd.f32 %v796_v41, %v792_v43  ;;  %v1147_v49 = vmul.f32 %v1139_v9, %v3251_v36  ;;  %vm547_vm15 = vcmp.ge.f32.partialorder %v2733_v54, 1.4  ;;  %2073 = vmatpush.bf16.msrb.mxu0 %v2534_v0 }
 0x2b4   :  { %v991_v12 = vmul.f32 %v983_v32, %v799_v53  ;;  %v1148_v48 = vmul.f32 %v1140_v52, %v3253_v1  ;;  %vm548_vm1 = vcmp.ge.f32.partialorder %v2762_v5, 1.4  ;;  %vm551_vm3 = vcmp.lt.f32.partialorder %v2733_v54, 1.8  ;;  %2546 = vmatpush.bf16.msrb.mxu3 %v2536_v42 }
 0x2b5   :  { %vm552_vm4 = vcmp.lt.f32.partialorder %v2762_v5, 1.8  ;;  %v992_v58 = vmul.f32 %v984_v17, %v800_v50  ;;  %vm555_vm5 = vmand %vm547_vm15, %vm551_vm3  ;;  %v3306_v35 = vadd.f32 -1.0, %v2733_v54  ;;  %v3309_v36 = vadd.f32 -1.0, %v2762_v5 }
 0x2b6   :  { %v995_v29 = vadd.f32 %v991_v12, %v987_v22  ;;  %vm556_vm6 = vmand %vm548_vm1, %vm552_vm4  ;;  %v3312_v11 = vsel %vm555_vm5, 1.0, %v3569_v47  ;;  %v811_v1 = vsub.f32 1.8, %v2733_v54  ;;  %v812_v37 = vsub.f32 1.8, %v2762_v5 }
 0x2b7   :  { %v999_v30 = vmul.f32 1.25, %v3269_v4  ;;  %v996_v24 = vadd.f32 %v992_v58, %v988_v38  ;;  %v3318_v44 = vsel %vm556_vm6, 1.0, %v3569_v47  ;;  %v807_v19 = vmul.f32 2.5, %v3306_v35  ;;  %2074 = vmatpush.bf16.msrb.mxu0 %v2533_v21 }
 0x2b8   :  { %v1151_v7 = vmul.f32 %v1143_v15, %v995_v29  ;;  %v808_v43 = vmul.f32 2.5, %v3309_v36  ;;  %v815_v34 = vmul.f32 2.5, %v811_v1  ;;  %v816_v27 = vmul.f32 2.5, %v812_v37  ;;  %2547 = vmatpush.bf16.msrb.mxu3 %v3290_v61 }
 0x2b9   :  { %v1000_v63 = vmul.f32 1.25, %v3272_v62  ;;  %v1152_v32 = vmul.f32 %v1144_v28, %v996_v24  ;;  %v819_v41 = vmul.f32 %v807_v19, %v3277_v46  ;;  %v1003_v22 = vmul.f32 1.25, %v811_v1 }
 0x2ba   :  { %v1155_v17 = vadd.f32 %v1151_v7, %v1147_v49  ;;  %v820_v9 = vmul.f32 %v808_v43, %v3282_v16  ;;  %v823_v59 = vmul.f32 %v815_v34, %v3312_v11  ;;  %v824_v38 = vmul.f32 %v816_v27, %v3318_v44 }
 0x2bb   :  { %v1004_v52 = vmul.f32 1.25, %v812_v37  ;;  %v1156_v15 = vadd.f32 %v1152_v32, %v1148_v48  ;;  %v1007_v12 = vmul.f32 %v999_v30, %v799_v53  ;;  %v1008_v58 = vmul.f32 %v1000_v63, %v800_v50 }
 0x2bc   :  { %v1223_v42 = vpack.c.bf16 %v1155_v17, %v1155_v17  ;;  %v3327_v4 = vadd.f32 %v823_v59, %v819_v41  ;;  %v3329_v62 = vadd.f32 %v824_v38, %v820_v9  ;;  %v1159_v28 = vmul.f32 0.8333333, %v3178_v2  ;;  %2548 = vmatpush.bf16.msrb.mxu3 %v2534_v0 }
 0x2bd   :  { %v1160_v46 = vmul.f32 0.8333333, %v3190_v33  ;;  %v1224_v16 = vpack.c.bf16 %v1156_v15, %v1156_v15  ;;  %v1163_v7 = vmul.f32 0.8333333, %v811_v1  ;;  %v1164_v19 = vmul.f32 0.8333333, %v812_v37 }
 0x2be   :  { %v1311_v49 = vunpack.c.l.b16 %v1223_v42  ;;  %v1011_v48 = vmul.f32 %v1003_v22, %v3327_v4  ;;  %v1012_v53 = vmul.f32 %v1004_v52, %v3329_v62  ;;  %v1167_v50 = vmul.f32 %v1159_v28, %v995_v29 }
 0x2bf   :  { %v1168_v30 = vmul.f32 %v1160_v46, %v996_v24  ;;  %v1312_v43 = vunpack.c.l.b16 %v1224_v16  ;;  %v1099_v34 = vmul.f32 0.8333333, %v2768_v8  ;;  %v1100_v27 = vmul.f32 0.8333333, %v2832_v55 }
 0x2c0   :  { %v1103_v2 = vmul.f32 0.8333333, %v3159_v39  ;;  %v3339_v33 = vadd.f32 %v1011_v48, %v1007_v12  ;;  %v3341_v61 = vadd.f32 %v1012_v53, %v1008_v58  ;;  %v1104_v1 = vmul.f32 0.8333333, %v3162_v56  ;;  %2549 = vmatpush.bf16.msrb.mxu3 %v2533_v21 }
 0x2c1   :  { %vm501_vm7 = vcmp.ge.f32.partialorder %v2812_v60, 0.2  ;;  %v1315_v37 = vpack.c.b16 %v1312_v43, %v1311_v49  ;;  %v1107_v29 = vmul.f32 %v1099_v34, %v2901_v3  ;;  %v1108_v24 = vmul.f32 %v1100_v27, %v2904_v10 }
 0x2c2   :  { %v1111_v8 = vmul.f32 %v1103_v2, %v3230_v25  ;;  %v1171_v55 = vmul.f32 %v1163_v7, %v3339_v33  ;;  %v1172_v39 = vmul.f32 %v1164_v19, %v3341_v61  ;;  %v1112_v63 = vmul.f32 %v1104_v1, %v3238_v6 }
 0x2c3   :  { %vm502_vm8 = vcmp.ge.f32.partialorder %v2848_v40, 0.2  ;;  %2041 = vmatmul.bf16.vlgmr.msra.gmra.mxu1 %v1315_v37  ;;  %vm505_vm9 = vcmp.lt.f32.partialorder %v2812_v60, 0.6  ;;  %vm506_vm10 = vcmp.lt.f32.partialorder %v2848_v40, 0.6 }
 0x2c4   :  { %v1115_v56 = vadd.f32 %v1111_v8, %v1107_v29  ;;  %vm517_vm11 = vcmp.ge.f32.partialorder %v2812_v60, 0.6  ;;  %v1175_v3 = vadd.f32 %v1171_v55, %v1167_v50  ;;  %v1176_v10 = vadd.f32 %v1172_v39, %v1168_v30  ;;  %vm509_vm12 = vmand %vm501_vm7, %vm505_vm9 }
 0x2c5   :  { %v1116_v0 = vadd.f32 %v1112_v63, %v1108_v24  ;;  %vm518_vm13 = vcmp.ge.f32.partialorder %v2848_v40, 0.6  ;;  %vm510_vm14 = vmand %vm502_vm8, %vm506_vm10  ;;  %v513_v6 = vsel %vm509_vm12, 1.0, %v3569_v47  ;;  %vm521_vm0 = vcmp.lt.f32.partialorder %v2812_v60, 1.0 }
 0x2c6   :  { %v1215_v25 = vpack.c.bf16 %v1115_v56, %v1115_v56  ;;  %vm522_vm2 = vcmp.lt.f32.partialorder %v2848_v40, 1.0  ;;  %v1227_v32 = vpack.c.bf16 %v1175_v3, %v1175_v3  ;;  %v1228_v17 = vpack.c.bf16 %v1176_v10, %v1176_v10  ;;  %vm525_vm15 = vmand %vm517_vm11, %vm521_vm0 }
 0x2c7   :  { %v1216_v41 = vpack.c.bf16 %v1116_v0, %v1116_v0  ;;  %v514_v22 = vsel %vm510_vm14, 1.0, %v3569_v47  ;;  %vm526_vm1 = vmand %vm518_vm13, %vm522_vm2  ;;  %v3365_v21 = vsel %vm525_vm15, 1.0, %v3569_v47  ;;  %v3368_v59 = vadd.f32 0.2, %v2812_v60 }
 0x2c8   :  { %v1287_v9 = vunpack.c.l.b16 %v1215_v25  ;;  %v3371_v38 = vadd.f32 0.2, %v2848_v40  ;;  %v1323_v52 = vunpack.c.l.b16 %v1227_v32  ;;  %v1324_v15 = vunpack.c.l.b16 %v1228_v17 }
 0x2c9   :  { %v1288_v42 = vunpack.c.l.b16 %v1216_v41  ;;  %v3374_v12 = vsel %vm526_vm1, 1.0, %v3569_v47  ;;  %v725_v58 = vmul.f32 2.5, %v3368_v59  ;;  %v3379_v46 = vsub.f32 0.6, %v2812_v60 }
 0x2ca   :  { %v726_v28 = vmul.f32 2.5, %v3371_v38  ;;  %v3382_v16 = vsub.f32 0.6, %v2848_v40  ;;  %v1327_v49 = vpack.c.b16 %v1324_v15, %v1323_v52  ;;  %v3385_v19 = vadd.f32 -0.2, %v2812_v60 }
 0x2cb   :  { %v1291_v7 = vpack.c.b16 %v1288_v42, %v1287_v9  ;;  %v3388_v48 = vadd.f32 -0.2, %v2848_v40  ;;  %v733_v53 = vmul.f32 2.5, %v3379_v46  ;;  %v737_v30 = vmul.f32 %v725_v58, %v3107_v18 }
 0x2cc   :  { %v734_v50 = vmul.f32 2.5, %v3382_v16  ;;  %v738_v43 = vmul.f32 %v726_v28, %v3112_v20  ;;  %2060 = vmatmul.bf16.vlgmr.msrb.gmra.mxu2 %v1327_v49  ;;  %v753_v34 = vmul.f32 2.5, %v3385_v19  ;;  %v757_v2 = vsub.f32 1.0, %v2812_v60 }
 0x2cd   :  { %2003 = vmatmul.bf16.vlgmr.msra.gmra.mxu3 %v1291_v7  ;;  %v754_v27 = vmul.f32 2.5, %v3388_v48  ;;  %v758_v1 = vsub.f32 1.0, %v2848_v40  ;;  %v741_v37 = vmul.f32 %v733_v53, %v513_v6  ;;  %v941_v24 = vmul.f32 1.25, %v3101_v13 }
 0x2ce   :  { %v742_v29 = vmul.f32 %v734_v50, %v514_v22  ;;  %v942_v8 = vmul.f32 1.25, %v3104_v26  ;;  %v761_v55 = vmul.f32 2.5, %v757_v2  ;;  %v765_v39 = vmul.f32 %v753_v34, %v513_v6 }
 0x2cf   :  { %v762_v18 = vmul.f32 2.5, %v758_v1  ;;  %v766_v20 = vmul.f32 %v754_v27, %v514_v22  ;;  %v745_v63 = vadd.f32 %v741_v37, %v737_v30  ;;  %v945_v3 = vmul.f32 1.25, %v3379_v46 }
 0x2d0   :  { %v746_v56 = vadd.f32 %v742_v29, %v738_v43  ;;  %v946_v10 = vmul.f32 1.25, %v3382_v16  ;;  %v769_v0 = vmul.f32 %v761_v55, %v3365_v21  ;;  %v949_v32 = vmul.f32 %v941_v24, %v3122_v57 }
 0x2d1   :  { %v770_v25 = vmul.f32 %v762_v18, %v3374_v12  ;;  %v950_v17 = vmul.f32 %v942_v8, %v3124_v23  ;;  %v953_v41 = vmul.f32 %v945_v3, %v745_v63  ;;  %v961_v52 = vmul.f32 1.25, %v3368_v59 }
 0x2d2   :  { %v954_v9 = vmul.f32 %v946_v10, %v746_v56  ;;  %v962_v6 = vmul.f32 1.25, %v3371_v38  ;;  %v773_v22 = vadd.f32 %v769_v0, %v765_v39  ;;  %v965_v42 = vmul.f32 1.25, %v757_v2 }
 0x2d3   :  { %v774_v15 = vadd.f32 %v770_v25, %v766_v20  ;;  %v966_v58 = vmul.f32 1.25, %v758_v1  ;;  %v3408_v28 = vadd.f32 %v953_v41, %v949_v32  ;;  %v969_v7 = vmul.f32 %v961_v52, %v745_v63  ;;  %v2532_v41 = vld [vmem:[#allocation2 + $0x218] sm:$0xff] }
 0x2d4   :  { %v3410_v49 = vadd.f32 %v954_v9, %v950_v17  ;;  %v970_v53 = vmul.f32 %v962_v6, %v746_v56  ;;  %v973_v50 = vmul.f32 %v965_v42, %v773_v22  ;;  %v1121_v23 = vmul.f32 0.8333333, %v3101_v13  ;;  %2075 = vmatpush.bf16.msrb.mxu0 %v2532_v41  ;;  %2550 = vmatpush.bf16.msrb.mxu3 %v2532_v41 }
 0x2d5   :  { %v974_v57 = vmul.f32 %v966_v58, %v774_v15  ;;  %v1122_v30 = vmul.f32 0.8333333, %v3104_v26  ;;  %v1125_v43 = vmul.f32 0.8333333, %v757_v2  ;;  %v1126_v34 = vmul.f32 0.8333333, %v758_v1 }
 0x2d6   :  { %vm533_vm3 = vcmp.ge.f32.partialorder %v2812_v60, 1.0  ;;  %vm534_vm4 = vcmp.ge.f32.partialorder %v2848_v40, 1.0  ;;  %v977_v27 = vadd.f32 %v973_v50, %v969_v7  ;;  %v1129_v29 = vmul.f32 %v1121_v23, %v3408_v28 }
 0x2d7   :  { %v978_v37 = vadd.f32 %v974_v57, %v970_v53  ;;  %v1130_v24 = vmul.f32 %v1122_v30, %v3410_v49  ;;  %vm537_vm5 = vcmp.lt.f32.partialorder %v2812_v60, 1.4  ;;  %vm538_vm6 = vcmp.lt.f32.partialorder %v2848_v40, 1.4  ;;  %v2531_v57 = vld [vmem:[#allocation2 + $0x210] sm:$0xff] }
 0x2d8   :  { %v3421_v13 = vadd.f32 -0.6, %v2812_v60  ;;  %v1133_v26 = vmul.f32 %v1125_v43, %v977_v27  ;;  %vm541_vm7 = vmand %vm533_vm3, %vm537_vm5  ;;  %v3424_v1 = vadd.f32 -0.6, %v2848_v40  ;;  %v785_v8 = vsub.f32 1.4, %v2812_v60  ;;  %2076 = vmatpush.bf16.msrb.mxu0 %v2531_v57  ;;  %2551 = vmatpush.bf16.msrb.mxu3 %v2531_v57 }
 0x2d9   :  { %v1134_v2 = vmul.f32 %v1126_v34, %v978_v37  ;;  %vm542_vm8 = vmand %vm534_vm4, %vm538_vm6  ;;  %v3428_v55 = vsel %vm541_vm7, 1.0, %v3569_v47  ;;  %v786_v39 = vsub.f32 1.4, %v2848_v40  ;;  %v981_v20 = vmul.f32 1.25, %v3385_v19 }
 0x2da   :  { %v781_v18 = vmul.f32 2.5, %v3421_v13  ;;  %v1137_v63 = vadd.f32 %v1133_v26, %v1129_v29  ;;  %v546_v3 = vsel %vm542_vm8, 1.0, %v3569_v47  ;;  %v782_v10 = vmul.f32 2.5, %v3424_v1 }
 0x2db   :  { %v1138_v56 = vadd.f32 %v1134_v2, %v1130_v24  ;;  %v789_v0 = vmul.f32 2.5, %v785_v8  ;;  %v790_v25 = vmul.f32 2.5, %v786_v39  ;;  %v982_v17 = vmul.f32 1.25, %v3388_v48 }
 0x2dc   :  { %v793_v32 = vmul.f32 %v781_v18, %v3365_v21  ;;  %v1221_v9 = vpack.c.bf16 %v1137_v63, %v1137_v63  ;;  %v794_v6 = vmul.f32 %v782_v10, %v3374_v12  ;;  %v985_v42 = vmul.f32 1.25, %v785_v8 }
 0x2dd   :  { %v1222_v52 = vpack.c.bf16 %v1138_v56, %v1138_v56  ;;  %v797_v58 = vmul.f32 %v789_v0, %v3428_v55  ;;  %v798_v7 = vmul.f32 %v790_v25, %v546_v3  ;;  %v986_v53 = vmul.f32 1.25, %v786_v39  ;;  %v2530_v56 = vld [vmem:[#allocation2 + $0x208] sm:$0xff] }
 0x2de   :  { %v989_v50 = vmul.f32 %v981_v20, %v773_v22  ;;  %v1301_v23 = vunpack.c.l.b16 %v1221_v9  ;;  %v990_v43 = vmul.f32 %v982_v17, %v774_v15  ;;  %v1141_v21 = vmul.f32 0.8333333, %v3368_v59  ;;  %2077 = vmatpush.bf16.msrb.mxu0 %v2530_v56  ;;  %v2529_v9 = vld [vmem:[#allocation2 + $0x200] sm:$0xff]  ;;  %2552 = vmatpush.bf16.msrb.mxu3 %v2530_v56 }
 0x2df   :  { %v1302_v30 = vunpack.c.l.b16 %v1222_v52  ;;  %v801_v34 = vadd.f32 %v797_v58, %v793_v32  ;;  %v802_v29 = vadd.f32 %v798_v7, %v794_v6  ;;  %v1142_v24 = vmul.f32 0.8333333, %v3371_v38 }
 0x2e0   :  { %v1145_v26 = vmul.f32 0.8333333, %v785_v8  ;;  %v1146_v2 = vmul.f32 0.8333333, %v786_v39  ;;  %v1149_v18 = vmul.f32 %v1141_v21, %v977_v27  ;;  %vm549_vm9 = vcmp.ge.f32.partialorder %v2812_v60, 1.4 }
 0x2e1   :  { %v1304_v12 = vpack.c.b16 %v1302_v30, %v1301_v23  ;;  %v993_v63 = vmul.f32 %v985_v42, %v801_v34  ;;  %v994_v22 = vmul.f32 %v986_v53, %v802_v29  ;;  %v1150_v20 = vmul.f32 %v1142_v24, %v978_v37 }
 0x2e2   :  { %vm550_vm10 = vcmp.ge.f32.partialorder %v2848_v40, 1.4  ;;  %vm553_vm11 = vcmp.lt.f32.partialorder %v2812_v60, 1.8  ;;  %vm554_vm12 = vcmp.lt.f32.partialorder %v2848_v40, 1.8  ;;  %2078 = vmatpush.bf16.msrb.mxu0 %v2529_v9  ;;  %2553 = vmatpush.bf16.msrb.mxu3 %v2529_v9 }
 0x2e3   :  { %2027 = vmatmul.bf16.gmra.mxu0 %v1304_v12  ;;  %v3446_v59 = vadd.f32 -1.0, %v2812_v60  ;;  %v3449_v38 = vadd.f32 -1.0, %v2848_v40  ;;  %v997_v15 = vadd.f32 %v993_v63, %v989_v50  ;;  %v998_v27 = vadd.f32 %v994_v22, %v990_v43  ;;  %vm557_vm13 = vmand %vm549_vm9, %vm553_vm11 }
 0x2e4   :  { %v813_v37 = vsub.f32 1.8, %v2812_v60  ;;  %v814_v8 = vsub.f32 1.8, %v2848_v40  ;;  %vm558_vm14 = vmand %vm550_vm10, %vm554_vm12  ;;  %v3456_v39 = vsel %vm557_vm13, 1.0, %v3569_v47  ;;  %v1001_v57 = vmul.f32 1.25, %v3421_v13 }
 0x2e5   :  { %v809_v10 = vmul.f32 2.5, %v3446_v59  ;;  %v810_v0 = vmul.f32 2.5, %v3449_v38  ;;  %v1153_v25 = vmul.f32 %v1145_v26, %v997_v15  ;;  %v1154_v32 = vmul.f32 %v1146_v2, %v998_v27 }
 0x2e6   :  { %v3461_v17 = vsel %vm558_vm14, 1.0, %v3569_v47  ;;  %v817_v41 = vmul.f32 2.5, %v813_v37  ;;  %v818_v52 = vmul.f32 2.5, %v814_v8  ;;  %v1002_v21 = vmul.f32 1.25, %v3424_v1 }
 0x2e7   :  { %v821_v6 = vmul.f32 %v809_v10, %v3428_v55  ;;  %v822_v42 = vmul.f32 %v810_v0, %v546_v3  ;;  %v1157_v58 = vadd.f32 %v1153_v25, %v1149_v18  ;;  %v1158_v7 = vadd.f32 %v1154_v32, %v1150_v20 }
 0x2e8   :  { %v825_v53 = vmul.f32 %v817_v41, %v3456_v39  ;;  %v826_v50 = vmul.f32 %v818_v52, %v3461_v17  ;;  %v1005_v26 = vmul.f32 1.25, %v813_v37  ;;  %v1006_v55 = vmul.f32 1.25, %v814_v8 }
 0x2e9   :  { %v1225_v23 = vpack.c.bf16 %v1157_v58, %v1157_v58  ;;  %v1226_v30 = vpack.c.bf16 %v1158_v7, %v1158_v7  ;;  %v1009_v2 = vmul.f32 %v1001_v57, %v801_v34  ;;  %v1010_v18 = vmul.f32 %v1002_v21, %v802_v29 }
 0x2ea   :  { %v3467_v43 = vadd.f32 %v825_v53, %v821_v6  ;;  %v3470_v24 = vadd.f32 %v826_v50, %v822_v42  ;;  %v1161_v56 = vmul.f32 0.8333333, %v3385_v19  ;;  %v1162_v10 = vmul.f32 0.8333333, %v3388_v48 }
 0x2eb   :  { %v1313_v3 = vunpack.c.l.b16 %v1225_v23  ;;  %v1314_v12 = vunpack.c.l.b16 %v1226_v30  ;;  %v1165_v32 = vmul.f32 0.8333333, %v813_v37  ;;  %v1166_v41 = vmul.f32 0.8333333, %v814_v8 }
 0x2ec   :  { %v1013_v63 = vmul.f32 %v1005_v26, %v3467_v43  ;;  %v1014_v22 = vmul.f32 %v1006_v55, %v3470_v24  ;;  %v1169_v9 = vmul.f32 %v1161_v56, %v997_v15  ;;  %v1170_v52 = vmul.f32 %v1162_v10, %v998_v27 }
 0x2ed   :  { %v1316_v20 = vpack.c.b16 %v1314_v12, %v1313_v3  ;;  %v1101_v29 = vmul.f32 0.8333333, %v3068_v31  ;;  %v1102_v6 = vmul.f32 0.8333333, %v3072_v51  ;;  %v2175_v42 = vadd.f32 -1.4, %v2812_v60 }
 0x2ee   :  { %v3476_v0 = vadd.f32 %v1013_v63, %v1009_v2  ;;  %v3478_v25 = vadd.f32 %v1014_v22, %v1010_v18  ;;  %v1105_v48 = vmul.f32 0.8333333, %v3379_v46  ;;  %v1106_v58 = vmul.f32 0.8333333, %v3382_v16 }
 0x2ef   :  { %2046 = vmatmul.bf16.gmra.mxu1 %v1316_v20  ;;  %v2176_v37 = vadd.f32 -1.4, %v2848_v40  ;;  %v1109_v15 = vmul.f32 %v1101_v29, %v3133_v45  ;;  %v1110_v27 = vmul.f32 %v1102_v6, %v3135_v14  ;;  %vm563_vm0 = vcmp.ge.f32.partialorder %v2733_v54, 1.8 }
 0x2f0   :  { %v1173_v34 = vmul.f32 %v1165_v32, %v3476_v0  ;;  %v1174_v19 = vmul.f32 %v1166_v41, %v3478_v25  ;;  %v1113_v31 = vmul.f32 %v1105_v48, %v3408_v28  ;;  %v1114_v51 = vmul.f32 %v1106_v58, %v3410_v49  ;;  %v3570_v58 = vld [vmem:[#allocation8_spill] sm:$0xff] }
 0x2f1   :  { %vm564_vm2 = vcmp.ge.f32.partialorder %v2762_v5, 1.8  ;;  %vm567_vm15 = vcmp.lt.f32.partialorder %v2733_v54, 2.2  ;;  %vm568_vm1 = vcmp.lt.f32.partialorder %v2762_v5, 2.2 }
 0x2f2   :  { %v1177_v7 = vadd.f32 %v1173_v34, %v1169_v9  ;;  %v1178_v8 = vadd.f32 %v1174_v19, %v1170_v52  ;;  %v1117_v16 = vadd.f32 %v1113_v31, %v1109_v15  ;;  %v1118_v50 = vadd.f32 %v1114_v51, %v1110_v27  ;;  %vm571_vm3 = vmand %vm563_vm0, %vm567_vm15 }
 0x2f3   :  { %v2173_v45 = vadd.f32 -1.4, %v2733_v54  ;;  %vm572_vm4 = vmand %vm564_vm2, %vm568_vm1  ;;  %v575_v28 = vsel %vm571_vm3, 1.0, %v3569_v47  ;;  %v2174_v49 = vadd.f32 -1.4, %v2762_v5  ;;  %v1019_v20 = vmul.f32 1.25, %v3306_v35 }
 0x2f4   :  { %v1229_v53 = vpack.c.bf16 %v1177_v7, %v1177_v7  ;;  %v1230_v46 = vpack.c.bf16 %v1178_v8, %v1178_v8  ;;  %v839_v57 = vsub.f32 2.2, %v2733_v54  ;;  %v1217_v30 = vpack.c.bf16 %v1117_v16, %v1117_v16  ;;  %v3571_v7 = vld [vmem:[#allocation9_spill] sm:$0xff] }
 0x2f5   :  { %v1218_v21 = vpack.c.bf16 %v1118_v50, %v1118_v50  ;;  %v576_v26 = vsel %vm572_vm4, 1.0, %v3569_v47  ;;  %v835_v55 = vmul.f32 2.5, %v2173_v45  ;;  %v836_v3 = vmul.f32 2.5, %v2174_v49 }
 0x2f6   :  { %v1325_v14 = vunpack.c.l.b16 %v1229_v53  ;;  %v1326_v23 = vunpack.c.l.b16 %v1230_v46  ;;  %v840_v12 = vsub.f32 2.2, %v2762_v5  ;;  %v843_v2 = vmul.f32 2.5, %v839_v57 }
 0x2f7   :  { %v1289_v63 = vunpack.c.l.b16 %v1217_v30  ;;  %v1290_v22 = vunpack.c.l.b16 %v1218_v21  ;;  %v847_v10 = vmul.f32 %v835_v55, %v3312_v11  ;;  %v848_v54 = vmul.f32 %v836_v3, %v3318_v44 }
 0x2f8   :  { %v1328_v18 = vpack.c.b16 %v1326_v23, %v1325_v14  ;;  %v844_v56 = vmul.f32 2.5, %v840_v12  ;;  %v851_v32 = vmul.f32 %v843_v2, %v575_v28  ;;  %v837_v41 = vmul.f32 2.5, %v2175_v42 }
 0x2f9   :  { %v838_v9 = vmul.f32 2.5, %v2176_v37  ;;  %v1292_v52 = vpack.c.b16 %v1290_v22, %v1289_v63  ;;  %v1020_v34 = vmul.f32 1.25, %v3309_v36  ;;  %v1023_v6 = vmul.f32 1.25, %v839_v57 }
 0x2fa   :  { %2065 = vmatmul.bf16.gmra.mxu2 %v1328_v18  ;;  %v852_v29 = vmul.f32 %v844_v56, %v576_v26  ;;  %v855_v5 = vadd.f32 %v851_v32, %v847_v10  ;;  %v1027_v19 = vmul.f32 %v1019_v20, %v3327_v4  ;;  %v1024_v48 = vmul.f32 1.25, %v840_v12 }
 0x2fb   :  { %2008 = vmatmul.bf16.gmra.mxu3 %v1292_v52  ;;  %v1028_v35 = vmul.f32 %v1020_v34, %v3329_v62  ;;  %v1179_v11 = vmul.f32 0.8333333, %v3570_v58  ;;  %v1180_v44 = vmul.f32 0.8333333, %v3571_v7  ;;  %v1183_v37 = vmul.f32 0.8333333, %v839_v57  ;;  %v1985_v7 = vpop.f32.mrf.mxu2 }
 0x2fc   :  { %v856_v15 = vadd.f32 %v852_v29, %v848_v54  ;;  %v1031_v42 = vmul.f32 %v1023_v6, %v855_v5  ;;  %vm565_vm5 = vcmp.ge.f32.partialorder %v2812_v60, 1.8  ;;  %vm566_vm6 = vcmp.ge.f32.partialorder %v2848_v40, 1.8  ;;  %v1947_v6 = vpop.f32.mrf.mxu0 }
 0x2fd   :  { %v1187_v36 = vmul.f32 %v1179_v11, %v3339_v33  ;;  %vm569_vm7 = vcmp.lt.f32.partialorder %v2812_v60, 2.2  ;;  %vm570_vm8 = vcmp.lt.f32.partialorder %v2848_v40, 2.2  ;;  %v841_v62 = vsub.f32 2.2, %v2812_v60 }
 0x2fe   :  { %v1032_v4 = vmul.f32 %v1024_v48, %v856_v15  ;;  %v1035_v27 = vadd.f32 %v1031_v42, %v1027_v19  ;;  %vm573_vm9 = vmand %vm565_vm5, %vm569_vm7  ;;  %v842_v8 = vsub.f32 2.2, %v2848_v40  ;;  %v849_v31 = vmul.f32 %v837_v41, %v3456_v39  ;;  %v1928_v48 = vpop.f32.mrf.mxu3 }
 0x2ff   :  { %v1184_v51 = vmul.f32 0.8333333, %v840_v12  ;;  %v1188_v53 = vmul.f32 %v1180_v44, %v3341_v61  ;;  %vm574_vm10 = vmand %vm566_vm6, %vm570_vm8  ;;  %v577_v33 = vsel %vm573_vm9, 1.0, %v3569_v47  ;;  %v845_v45 = vmul.f32 2.5, %v841_v62 }
 0x300   :  { %v1036_v46 = vadd.f32 %v1032_v4, %v1028_v35  ;;  %v1191_v16 = vmul.f32 %v1183_v37, %v1035_v27  ;;  %v578_v50 = vsel %vm574_vm10, 1.0, %v3569_v47  ;;  %v850_v14 = vmul.f32 %v838_v9, %v3461_v17 }
 0x301   :  { %v1021_v28 = vmul.f32 1.25, %v3446_v59  ;;  %v846_v60 = vmul.f32 2.5, %v842_v8  ;;  %v853_v57 = vmul.f32 %v845_v45, %v577_v33  ;;  %v1022_v39 = vmul.f32 1.25, %v3449_v38 }
 0x302   :  { %v1192_v49 = vmul.f32 %v1184_v51, %v1036_v46  ;;  %v1195_v40 = vadd.f32 %v1191_v16, %v1187_v36  ;;  %v1025_v55 = vmul.f32 1.25, %v841_v62  ;;  %v1181_v3 = vmul.f32 0.8333333, %v3421_v13 }
 0x303   :  { %v1029_v61 = vmul.f32 %v1021_v28, %v3467_v43  ;;  %v854_v23 = vmul.f32 %v846_v60, %v578_v50  ;;  %v857_v26 = vadd.f32 %v853_v57, %v849_v31  ;;  %v1030_v47 = vmul.f32 %v1022_v39, %v3470_v24  ;;  %v1987_v37 = vpop.f32.mrf.mxu2 }
 0x304   :  { %v1196_v30 = vadd.f32 %v1192_v49, %v1188_v53  ;;  %v1231_v21 = vpack.c.bf16 %v1195_v40, %v1195_v40  ;;  %v1026_v12 = vmul.f32 1.25, %v842_v8  ;;  %v1182_v18 = vmul.f32 0.8333333, %v3424_v1  ;;  %v1949_v19 = vpop.f32.mrf.mxu0 }
 0x305   :  { %v858_v17 = vadd.f32 %v854_v23, %v850_v14  ;;  %v1033_v2 = vmul.f32 %v1025_v55, %v857_v26  ;;  %v1189_v63 = vmul.f32 %v1181_v3, %v3476_v0  ;;  %v1185_v56 = vmul.f32 0.8333333, %v841_v62 }
 0x306   :  { %v1232_v59 = vpack.c.bf16 %v1196_v30, %v1196_v30  ;;  %v1335_v22 = vunpack.c.l.b16 %v1231_v21  ;;  %v1190_v10 = vmul.f32 %v1182_v18, %v3478_v25  ;;  %v1186_v32 = vmul.f32 0.8333333, %v842_v8  ;;  %v1930_v58 = vpop.f32.mrf.mxu3  ;;  %v1966_v25 = vpop.f32.mrf.mxu1 }
 0x307   :  { %v1034_v38 = vmul.f32 %v1026_v12, %v858_v17  ;;  %v1037_v20 = vadd.f32 %v1033_v2, %v1029_v61  ;;  %v1948_v31 = vadd.f32 %v1947_v6, %v1928_v48  ;;  %v1950_v16 = vadd.f32 %v1949_v19, %v1930_v58 }
 0x308   :  { %v1336_v43 = vunpack.c.l.b16 %v1232_v59 }
 0x309   :  { %v1038_v54 = vadd.f32 %v1034_v38, %v1030_v47  ;;  %v1193_v41 = vmul.f32 %v1185_v56, %v1037_v20  ;;  %v1967_v33 = vadd.f32 %v1966_v25, %v1948_v31 }
 0x30a   :  { %v1339_v24 = vpack.c.b16 %v1336_v43, %v1335_v22 }
 0x30b   :  { %v1194_v13 = vmul.f32 %v1186_v32, %v1038_v54  ;;  %v1197_v9 = vadd.f32 %v1193_v41, %v1189_v63  ;;  %v1986_v50 = vadd.f32 %v1985_v7, %v1967_v33 }
 0x30c   :  { %2079 = vmatmul.bf16.vlgmr.msrb.gmra.mxu0 %v1339_v24  ;;  %v1952_v35 = vpop.f32.mrf.mxu0 }
 0x30d   :  { %v1198_v52 = vadd.f32 %v1194_v13, %v1190_v10  ;;  %v1233_v34 = vpack.c.bf16 %v1197_v9, %v1197_v9 }
 0x30e   :  { %v1968_v15 = vpop.f32.mrf.mxu1 }
 0x30f   :  { %v1234_v29 = vpack.c.bf16 %v1198_v52, %v1198_v52  ;;  %v1337_v1 = vunpack.c.l.b16 %v1233_v34  ;;  %v1969_v60 = vadd.f32 %v1968_v15, %v1950_v16 }
 0x311   :  { %v1338_v5 = vunpack.c.l.b16 %v1234_v29  ;;  %v1988_v61 = vadd.f32 %v1987_v37, %v1969_v60 }
 0x313   :  { %v1340_v0 = vpack.c.b16 %v1338_v5, %v1337_v1 }
 0x314   :  { %v1954_v11 = vpop.f32.mrf.mxu0 }
 0x315   :  { %2084 = vmatmul.bf16.vlgmr.msrb.gmra.mxu3 %v1340_v0 }
 0x316   :  { %v1971_v4 = vpop.f32.mrf.mxu1 }
 0x31c   :  { %v1990_v62 = vpop.f32.mrf.mxu2 }
 0x31e   :  { %v1973_v51 = vpop.f32.mrf.mxu1 }
 0x324   :  { %v1992_v46 = vpop.f32.mrf.mxu2 }
 0x32f   :  { %v2023_v42 = vpop.f32.mrf.mxu0 }
 0x334   :  { %v1933_v44 = vpop.f32.mrf.mxu3 }
 0x335   :  { %v1953_v39 = vadd.f32 %v1952_v35, %v1933_v44 }
 0x337   :  { %v2025_v27 = vpop.f32.mrf.mxu0  ;;  %v1972_v26 = vadd.f32 %v1971_v4, %v1953_v39 }
 0x339   :  { %v1991_v59 = vadd.f32 %v1990_v62, %v1972_v26 }
 0x33c   :  { %v1935_v36 = vpop.f32.mrf.mxu3 }
 0x33d   :  { %v1955_v17 = vadd.f32 %v1954_v11, %v1935_v36 }
 0x33f   :  { %v1974_v22 = vadd.f32 %v1973_v51, %v1955_v17 }
 0x340   :  { %v2042_v14 = vpop.f32.mrf.mxu1 }
 0x341   :  { %v1993_v32 = vadd.f32 %v1992_v46, %v1974_v22 }
 0x348   :  { %v2044_v55 = vpop.f32.mrf.mxu1 }
 0x34f   :  { %v2061_v40 = vpop.f32.mrf.mxu2 }
 0x350   :  { %v2004_v8 = vpop.f32.mrf.mxu3 }
 0x351   :  { %v2005_v28 = vadd.f32 %v2004_v8, %v1986_v50 }
 0x353   :  { %v2024_v57 = vadd.f32 %v2023_v42, %v2005_v28 }
 0x355   :  { %v2043_v30 = vadd.f32 %v2042_v14, %v2024_v57 }
 0x357   :  { %v2062_v3 = vadd.f32 %v2061_v40, %v2043_v30  ;;  %v2063_v2 = vpop.f32.mrf.mxu2 }
 0x358   :  { %v2006_v45 = vpop.f32.mrf.mxu3 }
 0x359   :  { %v2007_v23 = vadd.f32 %v2006_v45, %v1988_v61 }
 0x35b   :  { %v2026_v47 = vadd.f32 %v2025_v27, %v2007_v23 }
 0x35d   :  { %v2045_v38 = vadd.f32 %v2044_v55, %v2026_v47 }
 0x35f   :  { %v2064_v10 = vadd.f32 %v2063_v2, %v2045_v38 }
 0x360   :  { %v2028_v53 = vpop.f32.mrf.mxu0 }
 0x368   :  { %v2030_v49 = vpop.f32.mrf.mxu0 }
 0x36c   :  { %v2047_v56 = vpop.f32.mrf.mxu1 }
 0x374   :  { %v2049_v5 = vpop.f32.mrf.mxu1 }
 0x37d   :  { %v2066_v9 = vpop.f32.mrf.mxu2 }
 0x37e   :  { %v2009_v21 = vpop.f32.mrf.mxu3 }
 0x37f   :  { %v2010_v63 = vadd.f32 %v2009_v21, %v1991_v59 }
 0x381   :  { %v2029_v20 = vadd.f32 %v2028_v53, %v2010_v63 }
 0x383   :  { %v2048_v13 = vadd.f32 %v2047_v56, %v2029_v20 }
 0x385   :  { %v2067_v34 = vadd.f32 %v2066_v9, %v2048_v13  ;;  %v2068_v6 = vpop.f32.mrf.mxu2 }
 0x386   :  { %v2011_v43 = vpop.f32.mrf.mxu3 }
 0x387   :  { %v2012_v41 = vadd.f32 %v2011_v43, %v1993_v32 }
 0x389   :  { %v2080_v12 = vpop.f32.mrf.mxu0  ;;  %v2031_v52 = vadd.f32 %v2030_v49, %v2012_v41 }
 0x38a   :  { %v2081_v18 = vadd.f32 %v2080_v12, %v2062_v3 }
 0x38b   :  { %v2050_v0 = vadd.f32 %v2049_v5, %v2031_v52 }
 0x38c   :  { %2090 = vst [vmem:[#allocation5] sm:$0xff] %v2081_v18 }
 0x38d   :  { %v2069_v19 = vadd.f32 %v2068_v6, %v2050_v0 }
 0x391   :  { %v2082_v54 = vpop.f32.mrf.mxu0 }
 0x392   :  { %v2083_v24 = vadd.f32 %v2082_v54, %v2064_v10 }
 0x394   :  { %2091 = vst [vmem:[#allocation5 + $0x8] sm:$0xff] %v2083_v24 }
 0x398   :  { %v2085_v29 = vpop.f32.mrf.mxu3 }
 0x399   :  { %v2086_v1 = vadd.f32 %v2085_v29, %v2067_v34 }
 0x39b   :  { %2092 = vst [vmem:[#allocation5 + $0x10] sm:$0xff] %v2086_v1 }
 0x3a0   :  { %v2087_v48 = vpop.f32.mrf.mxu3 }
 0x3a1   :  { %v2088_v35 = vadd.f32 %v2087_v48, %v2069_v19 }
 0x3a3   :  { %2093 = vst [vmem:[#allocation5 + $0x18] sm:$0xff] %v2088_v35 }
 0x3a4   :  { %2106 = dma.vmem_to_hbm [thread:$0]  %s2099_s12, 512, %s2101_s15, [#allocation4], %s2643_s16, %s2643_s16, %s2644_s17  }
 0x3a5   :  { %2636 = dma.done.wait [#allocation4], 512  }
 0x3a6   :  { %2637 = vsyncadd [#allocation4], 4294966784 }
 0x3a7   :  { %2111 = vsyncpa [#allocation3], 1 }
 0x3a8   :  { %2112 = vsyncpa [#allocation4], 1 }

</bundles_post_ra>
